<compile_context>
chip_gen: v7x
topology: tpu7x:2x2x1
jax: 0.10.0
libtpu: 0.0.40
codegen_flags: <defaults>
</compile_context>

<pallas_src>
import math
import jax
import jax.numpy as jnp
from jax.experimental import pallas as pl
from jax.experimental.pallas import tpu as pltpu


def _single_buffer_mode():
    """pl.Buffered(1): keep resident weights single-buffered (saves VMEM on v7x)."""
    try:
        return pl.Buffered(1)
    except Exception:  # pragma: no cover - older/newer API rejects buffer_count=1
        return None


def _make_kernel(bb: int, seq: int, num_heads: int, head_dim: int,
                 compute_dtype, exact_softmax: bool):
    embed = num_heads * head_dim
    inv_scale = 1.0 / math.sqrt(float(head_dim))

    def mha_kernel(x_ref, wqkv_ref, bqkv_ref, wo_ref, bo_ref, o_ref, ctx_ref):
        x = x_ref[0]                                        # (bb*S, E), compute_dtype

        # --- fused lane-dense QKV projection: one (bb*S, E) @ (E, 3E) MXU pass ---
        qkv = jnp.dot(x, wqkv_ref[...],
                      preferred_element_type=jnp.float32)   # (bb*S, 3E) f32
        qkv = qkv + bqkv_ref[...]                           # bias in f32

        # --- per-head attention, batched over the bb batch rows via einsum ---
        for h in range(num_heads):
            # Sub-128-lane head slices are unavoidable at Dh=8; keep head
            # boundaries 128-lane aligned for production shapes.
            q = qkv[:, h * head_dim:(h + 1) * head_dim] * inv_scale     # scale on q
            k = qkv[:, embed + h * head_dim:embed + (h + 1) * head_dim]
            v = qkv[:, 2 * embed + h * head_dim:2 * embed + (h + 1) * head_dim]

            # (bb*S, Dh) -> (bb, S, Dh): leading-dim split only, no lane change.
            qb = q.reshape(bb, seq, head_dim).astype(compute_dtype)
            kb = k.reshape(bb, seq, head_dim).astype(compute_dtype)
            vb = v.reshape(bb, seq, head_dim).astype(compute_dtype)

            s = jnp.einsum("bqd,bkd->bqk", qb, kb,
                           preferred_element_type=jnp.float32)          # (bb, S, S) f32
            m = jnp.max(s, axis=-1, keepdims=True)
            e = jnp.exp(s - m)
            l = jnp.sum(e, axis=-1, keepdims=True)
            if exact_softmax:
                p = e / l                                   # exact (f32 module semantics)
            else:
                p = e * pl.reciprocal(l, approx=True)       # EUP reciprocal (bf16 path)

            ctx = jnp.einsum("bqk,bkd->bqd", p.astype(compute_dtype), vb,
                             preferred_element_type=jnp.float32)        # (bb, S, Dh) f32
            # Write head context into the (bb*S, E) scratch: no list + concat.
            ctx_ref[:, h * head_dim:(h + 1) * head_dim] = ctx.reshape(bb * seq, head_dim)

        # --- ONE (bb*S, E) @ (E, E) output projection ---
        out = jnp.dot(ctx_ref[...].astype(compute_dtype), wo_ref[...],
                      preferred_element_type=jnp.float32) + bo_ref[...]  # (bb*S, E) f32

        # Lane-dense store: reshape to the output block's (rows, lanes) shape
        # ((bb, S*E) in the lane-dense layout; identity in the fallback layout).
        o_ref[0] = out.reshape(o_ref.shape[1], o_ref.shape[2]).astype(o_ref.dtype)

    return mha_kernel


def multi_head_attention(x, wq, wk, wv, bq, bk, bv, wo, bo, *,
                         compute_dtype=jnp.bfloat16, target_rows=256):
    """x: (B, S, E); wq/wk/wv: (H, E, Dh) (x @ W convention); bq/bk/bv: (H, 1, Dh);
       wo: (H, Dh, E); bo: (1, E).  Returns (B, S, E) in x.dtype.

       compute_dtype is the MXU operand dtype (default bf16: ~2-4x MXU rate and
       half the weight DMA bytes; accumulation stays f32). Pass jnp.float32 for
       exact module semantics (also switches softmax to an exact divide)."""
    B, S, E = x.shape
    H, _, Dh = wq.shape
    assert H * Dh == E

    # --- wrapper-side packing into lane-dense fused slabs ---
    wq_cat = jnp.transpose(wq, (1, 0, 2)).reshape(E, H * Dh)
    wk_cat = jnp.transpose(wk, (1, 0, 2)).reshape(E, H * Dh)
    wv_cat = jnp.transpose(wv, (1, 0, 2)).reshape(E, H * Dh)
    w_qkv = jnp.concatenate([wq_cat, wk_cat, wv_cat], axis=-1).astype(compute_dtype)  # (E, 3E)
    b_qkv = jnp.concatenate(
        [bq.reshape(1, H * Dh), bk.reshape(1, H * Dh), bv.reshape(1, H * Dh)],
        axis=-1).astype(jnp.float32)                                                   # (1, 3E)
    wo_full = wo.reshape(H * Dh, E).astype(compute_dtype)                              # (E, E)
    bo_full = bo.reshape(1, E).astype(jnp.float32)                                     # (1, E)

    # --- batch-block size: largest divisor of B with Bb*S <= target_rows ---
    bb = 1
    for d in range(1, B + 1):
        if B % d == 0 and d * S <= max(target_rows, S):
            bb = d
    nblk = B // bb

    # Re-block x so each grid step sees a (Bb*S, E) row slab (single MXU feed).
    x_blk = x.reshape(nblk, bb * S, E).astype(compute_dtype)

    exact_softmax = jnp.dtype(compute_dtype) == jnp.dtype(jnp.float32)
    kernel = _make_kernel(bb, S, H, Dh, compute_dtype, exact_softmax)

    def _wspec(shape, mode):
        idx = lambda g: (0, 0)  # grid-independent -> weights stay VMEM-resident
        if mode is None:
            return pl.BlockSpec(shape, idx)
        return pl.BlockSpec(shape, idx, pipeline_mode=mode)

    def run(weight_mode, lane_dense_out):
        if lane_dense_out:
            # Lane-dense output: last dim S*E (>=128), one unmasked slab per block.
            out_shape = jax.ShapeDtypeStruct((nblk, bb, S * E), x.dtype)
            out_spec = pl.BlockSpec((1, bb, S * E), lambda g: (g, 0, 0))
        else:
            out_shape = jax.ShapeDtypeStruct((nblk, bb * S, E), x.dtype)
            out_spec = pl.BlockSpec((1, bb * S, E), lambda g: (g, 0, 0))

        out = pl.pallas_call(
            kernel,
            out_shape=out_shape,
            grid_spec=pltpu.PrefetchScalarGridSpec(
                num_scalar_prefetch=0,
                grid=(nblk,),
                in_specs=[
                    pl.BlockSpec((1, bb * S, E), lambda g: (g, 0, 0)),  # x row slab
                    _wspec((E, 3 * E), weight_mode),   # fused QKV weights (resident)
                    _wspec((1, 3 * E), weight_mode),   # fused QKV bias    (resident)
                    _wspec((E, E), weight_mode),       # output weights    (resident)
                    _wspec((1, E), weight_mode),       # output bias       (resident)
                ],
                out_specs=out_spec,
                scratch_shapes=[pltpu.VMEM((bb * S, E), jnp.float32)],  # ctx scratch
            ),
            compiler_params=pltpu.CompilerParams(
                dimension_semantics=("parallel",),       # shards batch blocks across TCs
                vmem_limit_bytes=48 * 1024 * 1024,       # headroom under v7x's 64 MiB
            ),
        )(x_blk, w_qkv, b_qkv, wo_full, bo_full)
        return out.reshape(B, S, E)

    # Graceful degradation: prefer single-buffered weights + lane-dense output,
    # fall back if the running JAX/Mosaic rejects either.
    attempts = ((_single_buffer_mode(), True), (None, True), (None, False))
    last_err = None
    for weight_mode, lane_dense in attempts:
        try:
            return run(weight_mode, lane_dense)
        except Exception as err:  # pragma: no cover - fallback path
            last_err = err
    raise last_err


def reference_mha(x, wq, wk, wv, bq, bk, bv, wo, bo):
    """Plain-JAX replica of the PyTorch forward for verification."""
    H, _, Dh = wq.shape
    head_outs = []
    for h in range(H):
        q = x @ wq[h] + bq[h]          # (B, S, Dh)
        k = x @ wk[h] + bk[h]
        v = x @ wv[h] + bv[h]
        scores = (q @ jnp.swapaxes(k, -2, -1)) / math.sqrt(Dh)
        probs = jax.nn.softmax(scores, axis=-1)
        head_outs.append(probs @ v)
    cat = jnp.concatenate(head_outs, axis=-1)                        # (B, S, E)
    wo_full = jnp.concatenate([wo[h] for h in range(H)], axis=0)     # (E, E)
    return cat @ wo_full + bo


if __name__ == "__main__":
    B, S, E, H = 2, 8, 32, 4
    Dh = E // H

    key = jax.random.PRNGKey(0)
    keys = jax.random.split(key, 10)
    x  = jax.random.normal(keys[0], (B, S, E), dtype=jnp.float32)
    wq = jax.random.normal(keys[1], (H, E, Dh), dtype=jnp.float32) * 0.1
    wk = jax.random.normal(keys[2], (H, E, Dh), dtype=jnp.float32) * 0.1
    wv = jax.random.normal(keys[3], (H, E, Dh), dtype=jnp.float32) * 0.1
    bq = jax.random.normal(keys[4], (H, 1, Dh), dtype=jnp.float32) * 0.1
    bk = jax.random.normal(keys[5], (H, 1, Dh), dtype=jnp.float32) * 0.1
    bv = jax.random.normal(keys[6], (H, 1, Dh), dtype=jnp.float32) * 0.1
    wo = jax.random.normal(keys[7], (H, Dh, E), dtype=jnp.float32) * 0.1
    bo = jax.random.normal(keys[8], (1, E), dtype=jnp.float32) * 0.1

    ref = reference_mha(x, wq, wk, wv, bq, bk, bv, wo, bo)

    # f32 MXU-operand path: exact softmax division, matches module semantics.
    out_f32 = jax.block_until_ready(
        multi_head_attention(x, wq, wk, wv, bq, bk, bv, wo, bo,
                             compute_dtype=jnp.float32))
    assert out_f32.shape == (B, S, E)
    assert jnp.allclose(out_f32, ref, atol=5e-3, rtol=5e-3), "f32 path mismatch vs reference"

    # bf16 default path (perf-recommended): f32 accumulation, looser tolerance.
    out_bf16 = jax.block_until_ready(
        multi_head_attention(x, wq, wk, wv, bq, bk, bv, wo, bo))
    assert out_bf16.shape == (B, S, E)
    assert jnp.allclose(out_bf16, ref, atol=5e-2, rtol=5e-2), "bf16 path mismatch vs reference"

    print("KERNEL_OK")
</pallas_src>

<mosaic_0001>
module attributes {stable_mosaic.version = 11 : i64} {
  func.func @mha_kernel(%arg0: i32, %arg1: memref<1x16x32xf32, #tpu.memory_space<vmem>>, %arg2: memref<32x96xf32, #tpu.memory_space<vmem>>, %arg3: memref<1x96xf32, #tpu.memory_space<vmem>>, %arg4: memref<32x32xf32, #tpu.memory_space<vmem>>, %arg5: memref<1x32xf32, #tpu.memory_space<vmem>>, %arg6: memref<1x2x256xf32, #tpu.memory_space<vmem>>, %arg7: memref<16x32xf32, #tpu.memory_space<vmem>>) attributes {dimension_semantics = [#tpu.dimension_semantics<parallel>], iteration_bounds = array<i64: 1>, scalar_prefetch = 0 : i64, scratch_operands = 1 : i64, tpu.core_type = #tpu.core_type<tc>, window_params = [{transform_indices = @transform_0, window_bounds = array<i64: 1, 16, 32>}, {pipeline_mode = #tpu.pipeline_mode<synchronous>, transform_indices = @transform_1, window_bounds = array<i64: 32, 96>}, {pipeline_mode = #tpu.pipeline_mode<synchronous>, transform_indices = @transform_2, window_bounds = array<i64: 1, 96>}, {pipeline_mode = #tpu.pipeline_mode<synchronous>, transform_indices = @transform_3, window_bounds = array<i64: 32, 32>}, {pipeline_mode = #tpu.pipeline_mode<synchronous>, transform_indices = @transform_4, window_bounds = array<i64: 1, 32>}, {transform_indices = @transform_5, window_bounds = array<i64: 1, 2, 256>}]} {
    %c0 = arith.constant 0 : index
    %c0_0 = arith.constant 0 : index
    %c0_1 = arith.constant 0 : index
    %0 = vector.load %arg1[%c0, %c0_0, %c0_1] : memref<1x16x32xf32, #tpu.memory_space<vmem>>, vector<1x16x32xf32>
    %1 = vector.shape_cast %0 : vector<1x16x32xf32> to vector<16x32xf32>
    %c0_2 = arith.constant 0 : index
    %c0_3 = arith.constant 0 : index
    %2 = vector.load %arg2[%c0_2, %c0_3] : memref<32x96xf32, #tpu.memory_space<vmem>>, vector<32x96xf32>
    %cst = arith.constant dense<0.000000e+00> : vector<16x96xf32>
    %3 = tpu.matmul %1, %2, %cst {dimension_numbers = #tpu.dot_dimension_numbers<[1], [0], [0], [1], [0, 0, 1, 1], [], []>} : vector<16x32xf32>, vector<32x96xf32>, vector<16x96xf32> -> vector<16x96xf32>
    %c0_4 = arith.constant 0 : index
    %c0_5 = arith.constant 0 : index
    %4 = vector.load %arg3[%c0_4, %c0_5] : memref<1x96xf32, #tpu.memory_space<vmem>>, vector<1x96xf32>
    %5 = vector.broadcast %4 : vector<1x96xf32> to vector<16x96xf32>
    %6 = arith.addf %3, %5 : vector<16x96xf32>
    %7 = vector.extract_strided_slice %6 {offsets = [0, 0], sizes = [16, 8], strides = [1, 1]} : vector<16x96xf32> to vector<16x8xf32>
    %cst_6 = arith.constant 0.353553385 : f32
    %8 = vector.broadcast %cst_6 : f32 to vector<16x8xf32>
    %9 = arith.mulf %7, %8 : vector<16x8xf32>
    %10 = vector.extract_strided_slice %6 {offsets = [0, 32], sizes = [16, 8], strides = [1, 1]} : vector<16x96xf32> to vector<16x8xf32>
    %11 = vector.extract_strided_slice %6 {offsets = [0, 64], sizes = [16, 8], strides = [1, 1]} : vector<16x96xf32> to vector<16x8xf32>
    %12 = vector.shape_cast %9 : vector<16x8xf32> to vector<2x8x8xf32>
    %13 = vector.shape_cast %10 : vector<16x8xf32> to vector<2x8x8xf32>
    %14 = vector.shape_cast %11 : vector<16x8xf32> to vector<2x8x8xf32>
    "tpu.trace_start"() <{level = 10 : i32, message = "bqd,bkd->bqk"}> : () -> ()
    %cst_7 = arith.constant dense<0.000000e+00> : vector<2x8x8xf32>
    %15 = tpu.matmul %12, %13, %cst_7 {dimension_numbers = #tpu.dot_dimension_numbers<[2], [2], [1], [1], [0, 0, 0, 1, 1, 1], [0], [0]>} : vector<2x8x8xf32>, vector<2x8x8xf32>, vector<2x8x8xf32> -> vector<2x8x8xf32>
    "tpu.trace_stop"() : () -> ()
    %cst_8 = arith.constant dense<0xFF800000> : vector<2x8xf32>
    %16 = vector.multi_reduction <maximumf>, %15, %cst_8 [2] : vector<2x8x8xf32> to vector<2x8xf32>
    %17 = vector.shape_cast %16 : vector<2x8xf32> to vector<2x8x1xf32>
    %18 = vector.broadcast %17 : vector<2x8x1xf32> to vector<2x8x8xf32>
    %19 = arith.subf %15, %18 : vector<2x8x8xf32>
    %20 = math.exp %19 : vector<2x8x8xf32>
    %cst_9 = arith.constant dense<0.000000e+00> : vector<2x8xf32>
    %21 = vector.multi_reduction <add>, %20, %cst_9 [2] : vector<2x8x8xf32> to vector<2x8xf32>
    %22 = vector.shape_cast %21 : vector<2x8xf32> to vector<2x8x1xf32>
    %23 = vector.broadcast %22 : vector<2x8x1xf32> to vector<2x8x8xf32>
    %24 = arith.divf %20, %23 : vector<2x8x8xf32>
    "tpu.trace_start"() <{level = 10 : i32, message = "bqk,bkd->bqd"}> : () -> ()
    %cst_10 = arith.constant dense<0.000000e+00> : vector<2x8x8xf32>
    %25 = tpu.matmul %24, %14, %cst_10 {dimension_numbers = #tpu.dot_dimension_numbers<[2], [1], [1], [2], [0, 0, 0, 1, 1, 2], [0], [0]>} : vector<2x8x8xf32>, vector<2x8x8xf32>, vector<2x8x8xf32> -> vector<2x8x8xf32>
    "tpu.trace_stop"() : () -> ()
    %26 = vector.shape_cast %25 : vector<2x8x8xf32> to vector<16x8xf32>
    %c0_11 = arith.constant 0 : index
    %c0_12 = arith.constant 0 : index
    %27 = vector.load %arg7[%c0_11, %c0_12] : memref<16x32xf32, #tpu.memory_space<vmem>>, vector<16x8xf32>
    tpu.vector_store %arg7[%c0_11, %c0_12], %26 {strides = array<i32>} : memref<16x32xf32, #tpu.memory_space<vmem>>, vector<16x8xf32>,
    %28 = vector.extract_strided_slice %6 {offsets = [0, 8], sizes = [16, 8], strides = [1, 1]} : vector<16x96xf32> to vector<16x8xf32>
    %cst_13 = arith.constant 0.353553385 : f32
    %29 = vector.broadcast %cst_13 : f32 to vector<16x8xf32>
    %30 = arith.mulf %28, %29 : vector<16x8xf32>
    %31 = vector.extract_strided_slice %6 {offsets = [0, 40], sizes = [16, 8], strides = [1, 1]} : vector<16x96xf32> to vector<16x8xf32>
    %32 = vector.extract_strided_slice %6 {offsets = [0, 72], sizes = [16, 8], strides = [1, 1]} : vector<16x96xf32> to vector<16x8xf32>
    %33 = vector.shape_cast %30 : vector<16x8xf32> to vector<2x8x8xf32>
    %34 = vector.shape_cast %31 : vector<16x8xf32> to vector<2x8x8xf32>
    %35 = vector.shape_cast %32 : vector<16x8xf32> to vector<2x8x8xf32>
    "tpu.trace_start"() <{level = 10 : i32, message = "bqd,bkd->bqk"}> : () -> ()
    %cst_14 = arith.constant dense<0.000000e+00> : vector<2x8x8xf32>
    %36 = tpu.matmul %33, %34, %cst_14 {dimension_numbers = #tpu.dot_dimension_numbers<[2], [2], [1], [1], [0, 0, 0, 1, 1, 1], [0], [0]>} : vector<2x8x8xf32>, vector<2x8x8xf32>, vector<2x8x8xf32> -> vector<2x8x8xf32>
    "tpu.trace_stop"() : () -> ()
    %cst_15 = arith.constant dense<0xFF800000> : vector<2x8xf32>
    %37 = vector.multi_reduction <maximumf>, %36, %cst_15 [2] : vector<2x8x8xf32> to vector<2x8xf32>
    %38 = vector.shape_cast %37 : vector<2x8xf32> to vector<2x8x1xf32>
    %39 = vector.broadcast %38 : vector<2x8x1xf32> to vector<2x8x8xf32>
    %40 = arith.subf %36, %39 : vector<2x8x8xf32>
    %41 = math.exp %40 : vector<2x8x8xf32>
    %cst_16 = arith.constant dense<0.000000e+00> : vector<2x8xf32>
    %42 = vector.multi_reduction <add>, %41, %cst_16 [2] : vector<2x8x8xf32> to vector<2x8xf32>
    %43 = vector.shape_cast %42 : vector<2x8xf32> to vector<2x8x1xf32>
    %44 = vector.broadcast %43 : vector<2x8x1xf32> to vector<2x8x8xf32>
    %45 = arith.divf %41, %44 : vector<2x8x8xf32>
    "tpu.trace_start"() <{level = 10 : i32, message = "bqk,bkd->bqd"}> : () -> ()
    %cst_17 = arith.constant dense<0.000000e+00> : vector<2x8x8xf32>
    %46 = tpu.matmul %45, %35, %cst_17 {dimension_numbers = #tpu.dot_dimension_numbers<[2], [1], [1], [2], [0, 0, 0, 1, 1, 2], [0], [0]>} : vector<2x8x8xf32>, vector<2x8x8xf32>, vector<2x8x8xf32> -> vector<2x8x8xf32>
    "tpu.trace_stop"() : () -> ()
    %47 = vector.shape_cast %46 : vector<2x8x8xf32> to vector<16x8xf32>
    %c0_18 = arith.constant 0 : index
    %c8 = arith.constant 8 : index
    %48 = vector.load %arg7[%c0_18, %c8] : memref<16x32xf32, #tpu.memory_space<vmem>>, vector<16x8xf32>
    tpu.vector_store %arg7[%c0_18, %c8], %47 {strides = array<i32>} : memref<16x32xf32, #tpu.memory_space<vmem>>, vector<16x8xf32>,
    %49 = vector.extract_strided_slice %6 {offsets = [0, 16], sizes = [16, 8], strides = [1, 1]} : vector<16x96xf32> to vector<16x8xf32>
    %cst_19 = arith.constant 0.353553385 : f32
    %50 = vector.broadcast %cst_19 : f32 to vector<16x8xf32>
    %51 = arith.mulf %49, %50 : vector<16x8xf32>
    %52 = vector.extract_strided_slice %6 {offsets = [0, 48], sizes = [16, 8], strides = [1, 1]} : vector<16x96xf32> to vector<16x8xf32>
    %53 = vector.extract_strided_slice %6 {offsets = [0, 80], sizes = [16, 8], strides = [1, 1]} : vector<16x96xf32> to vector<16x8xf32>
    %54 = vector.shape_cast %51 : vector<16x8xf32> to vector<2x8x8xf32>
    %55 = vector.shape_cast %52 : vector<16x8xf32> to vector<2x8x8xf32>
    %56 = vector.shape_cast %53 : vector<16x8xf32> to vector<2x8x8xf32>
    "tpu.trace_start"() <{level = 10 : i32, message = "bqd,bkd->bqk"}> : () -> ()
    %cst_20 = arith.constant dense<0.000000e+00> : vector<2x8x8xf32>
    %57 = tpu.matmul %54, %55, %cst_20 {dimension_numbers = #tpu.dot_dimension_numbers<[2], [2], [1], [1], [0, 0, 0, 1, 1, 1], [0], [0]>} : vector<2x8x8xf32>, vector<2x8x8xf32>, vector<2x8x8xf32> -> vector<2x8x8xf32>
    "tpu.trace_stop"() : () -> ()
    %cst_21 = arith.constant dense<0xFF800000> : vector<2x8xf32>
    %58 = vector.multi_reduction <maximumf>, %57, %cst_21 [2] : vector<2x8x8xf32> to vector<2x8xf32>
    %59 = vector.shape_cast %58 : vector<2x8xf32> to vector<2x8x1xf32>
    %60 = vector.broadcast %59 : vector<2x8x1xf32> to vector<2x8x8xf32>
    %61 = arith.subf %57, %60 : vector<2x8x8xf32>
    %62 = math.exp %61 : vector<2x8x8xf32>
    %cst_22 = arith.constant dense<0.000000e+00> : vector<2x8xf32>
    %63 = vector.multi_reduction <add>, %62, %cst_22 [2] : vector<2x8x8xf32> to vector<2x8xf32>
    %64 = vector.shape_cast %63 : vector<2x8xf32> to vector<2x8x1xf32>
    %65 = vector.broadcast %64 : vector<2x8x1xf32> to vector<2x8x8xf32>
    %66 = arith.divf %62, %65 : vector<2x8x8xf32>
    "tpu.trace_start"() <{level = 10 : i32, message = "bqk,bkd->bqd"}> : () -> ()
    %cst_23 = arith.constant dense<0.000000e+00> : vector<2x8x8xf32>
    %67 = tpu.matmul %66, %56, %cst_23 {dimension_numbers = #tpu.dot_dimension_numbers<[2], [1], [1], [2], [0, 0, 0, 1, 1, 2], [0], [0]>} : vector<2x8x8xf32>, vector<2x8x8xf32>, vector<2x8x8xf32> -> vector<2x8x8xf32>
    "tpu.trace_stop"() : () -> ()
    %68 = vector.shape_cast %67 : vector<2x8x8xf32> to vector<16x8xf32>
    %c0_24 = arith.constant 0 : index
    %c16 = arith.constant 16 : index
    %69 = vector.load %arg7[%c0_24, %c16] : memref<16x32xf32, #tpu.memory_space<vmem>>, vector<16x8xf32>
    tpu.vector_store %arg7[%c0_24, %c16], %68 {strides = array<i32>} : memref<16x32xf32, #tpu.memory_space<vmem>>, vector<16x8xf32>,
    %70 = vector.extract_strided_slice %6 {offsets = [0, 24], sizes = [16, 8], strides = [1, 1]} : vector<16x96xf32> to vector<16x8xf32>
    %cst_25 = arith.constant 0.353553385 : f32
    %71 = vector.broadcast %cst_25 : f32 to vector<16x8xf32>
    %72 = arith.mulf %70, %71 : vector<16x8xf32>
    %73 = vector.extract_strided_slice %6 {offsets = [0, 56], sizes = [16, 8], strides = [1, 1]} : vector<16x96xf32> to vector<16x8xf32>
    %74 = vector.extract_strided_slice %6 {offsets = [0, 88], sizes = [16, 8], strides = [1, 1]} : vector<16x96xf32> to vector<16x8xf32>
    %75 = vector.shape_cast %72 : vector<16x8xf32> to vector<2x8x8xf32>
    %76 = vector.shape_cast %73 : vector<16x8xf32> to vector<2x8x8xf32>
    %77 = vector.shape_cast %74 : vector<16x8xf32> to vector<2x8x8xf32>
    "tpu.trace_start"() <{level = 10 : i32, message = "bqd,bkd->bqk"}> : () -> ()
    %cst_26 = arith.constant dense<0.000000e+00> : vector<2x8x8xf32>
    %78 = tpu.matmul %75, %76, %cst_26 {dimension_numbers = #tpu.dot_dimension_numbers<[2], [2], [1], [1], [0, 0, 0, 1, 1, 1], [0], [0]>} : vector<2x8x8xf32>, vector<2x8x8xf32>, vector<2x8x8xf32> -> vector<2x8x8xf32>
    "tpu.trace_stop"() : () -> ()
    %cst_27 = arith.constant dense<0xFF800000> : vector<2x8xf32>
    %79 = vector.multi_reduction <maximumf>, %78, %cst_27 [2] : vector<2x8x8xf32> to vector<2x8xf32>
    %80 = vector.shape_cast %79 : vector<2x8xf32> to vector<2x8x1xf32>
    %81 = vector.broadcast %80 : vector<2x8x1xf32> to vector<2x8x8xf32>
    %82 = arith.subf %78, %81 : vector<2x8x8xf32>
    %83 = math.exp %82 : vector<2x8x8xf32>
    %cst_28 = arith.constant dense<0.000000e+00> : vector<2x8xf32>
    %84 = vector.multi_reduction <add>, %83, %cst_28 [2] : vector<2x8x8xf32> to vector<2x8xf32>
    %85 = vector.shape_cast %84 : vector<2x8xf32> to vector<2x8x1xf32>
    %86 = vector.broadcast %85 : vector<2x8x1xf32> to vector<2x8x8xf32>
    %87 = arith.divf %83, %86 : vector<2x8x8xf32>
    "tpu.trace_start"() <{level = 10 : i32, message = "bqk,bkd->bqd"}> : () -> ()
    %cst_29 = arith.constant dense<0.000000e+00> : vector<2x8x8xf32>
    %88 = tpu.matmul %87, %77, %cst_29 {dimension_numbers = #tpu.dot_dimension_numbers<[2], [1], [1], [2], [0, 0, 0, 1, 1, 2], [0], [0]>} : vector<2x8x8xf32>, vector<2x8x8xf32>, vector<2x8x8xf32> -> vector<2x8x8xf32>
    "tpu.trace_stop"() : () -> ()
    %89 = vector.shape_cast %88 : vector<2x8x8xf32> to vector<16x8xf32>
    %c0_30 = arith.constant 0 : index
    %c24 = arith.constant 24 : index
    %90 = vector.load %arg7[%c0_30, %c24] : memref<16x32xf32, #tpu.memory_space<vmem>>, vector<16x8xf32>
    tpu.vector_store %arg7[%c0_30, %c24], %89 {strides = array<i32>} : memref<16x32xf32, #tpu.memory_space<vmem>>, vector<16x8xf32>,
    %c0_31 = arith.constant 0 : index
    %c0_32 = arith.constant 0 : index
    %91 = vector.load %arg7[%c0_31, %c0_32] : memref<16x32xf32, #tpu.memory_space<vmem>>, vector<16x32xf32>
    %c0_33 = arith.constant 0 : index
    %c0_34 = arith.constant 0 : index
    %92 = vector.load %arg4[%c0_33, %c0_34] : memref<32x32xf32, #tpu.memory_space<vmem>>, vector<32x32xf32>
    %cst_35 = arith.constant dense<0.000000e+00> : vector<16x32xf32>
    %93 = tpu.matmul %91, %92, %cst_35 {dimension_numbers = #tpu.dot_dimension_numbers<[1], [0], [0], [1], [0, 0, 1, 1], [], []>} : vector<16x32xf32>, vector<32x32xf32>, vector<16x32xf32> -> vector<16x32xf32>
    %c0_36 = arith.constant 0 : index
    %c0_37 = arith.constant 0 : index
    %94 = vector.load %arg5[%c0_36, %c0_37] : memref<1x32xf32, #tpu.memory_space<vmem>>, vector<1x32xf32>
    %95 = vector.broadcast %94 : vector<1x32xf32> to vector<16x32xf32>
    %96 = arith.addf %93, %95 : vector<16x32xf32>
    %97 = vector.shape_cast %96 : vector<16x32xf32> to vector<2x256xf32>
    %c0_38 = arith.constant 0 : index
    %c0_39 = arith.constant 0 : index
    %c0_40 = arith.constant 0 : index
    %98 = vector.load %arg6[%c0_38, %c0_39, %c0_40] : memref<1x2x256xf32, #tpu.memory_space<vmem>>, vector<1x2x256xf32>
    %99 = vector.shape_cast %98 : vector<1x2x256xf32> to vector<2x256xf32>
    %100 = vector.shape_cast %97 : vector<2x256xf32> to vector<1x2x256xf32>
    tpu.vector_store %arg6[%c0_38, %c0_39, %c0_40], %100 {strides = array<i32>} : memref<1x2x256xf32, #tpu.memory_space<vmem>>, vector<1x2x256xf32>,
    return
  }
  func.func @transform_0(%arg0: i32) -> (i32, i32, i32) {
    %c0_i32 = arith.constant 0 : i32
    %c0_i32_0 = arith.constant 0 : i32
    %c0_i32_1 = arith.constant 0 : i32
    return %arg0, %c0_i32, %c0_i32_0 : i32, i32, i32
  }
  func.func @transform_1(%arg0: i32) -> (i32, i32) {
    %c0_i32 = arith.constant 0 : i32
    %c0_i32_0 = arith.constant 0 : i32
    %c0_i32_1 = arith.constant 0 : i32
    return %c0_i32, %c0_i32_0 : i32, i32
  }
  func.func @transform_2(%arg0: i32) -> (i32, i32) {
    %c0_i32 = arith.constant 0 : i32
    %c0_i32_0 = arith.constant 0 : i32
    %c0_i32_1 = arith.constant 0 : i32
    return %c0_i32, %c0_i32_0 : i32, i32
  }
  func.func @transform_3(%arg0: i32) -> (i32, i32) {
    %c0_i32 = arith.constant 0 : i32
    %c0_i32_0 = arith.constant 0 : i32
    %c0_i32_1 = arith.constant 0 : i32
    return %c0_i32, %c0_i32_0 : i32, i32
  }
  func.func @transform_4(%arg0: i32) -> (i32, i32) {
    %c0_i32 = arith.constant 0 : i32
    %c0_i32_0 = arith.constant 0 : i32
    %c0_i32_1 = arith.constant 0 : i32
    return %c0_i32, %c0_i32_0 : i32, i32
  }
  func.func @transform_5(%arg0: i32) -> (i32, i32, i32) {
    %c0_i32 = arith.constant 0 : i32
    %c0_i32_0 = arith.constant 0 : i32
    %c0_i32_1 = arith.constant 0 : i32
    return %arg0, %c0_i32, %c0_i32_0 : i32, i32, i32
  }
}

module attributes {stable_mosaic.version = 11 : i64} {
  func.func @mha_kernel(%arg0: i32, %arg1: memref<1x16x32xf32, #tpu.memory_space<vmem>>, %arg2: memref<32x96xf32, #tpu.memory_space<vmem>>, %arg3: memref<1x96xf32, #tpu.memory_space<vmem>>, %arg4: memref<32x32xf32, #tpu.memory_space<vmem>>, %arg5: memref<1x32xf32, #tpu.memory_space<vmem>>, %arg6: memref<1x2x256xf32, #tpu.memory_space<vmem>>, %arg7: memref<16x32xf32, #tpu.memory_space<vmem>>) attributes {dimension_semantics = [#tpu.dimension_semantics<parallel>], iteration_bounds = array<i64: 1>, scalar_prefetch = 0 : i64, scratch_operands = 1 : i64, tpu.core_type = #tpu.core_type<tc>, window_params = [{transform_indices = @transform_0, window_bounds = array<i64: 1, 16, 32>}, {pipeline_mode = #tpu.pipeline_mode<synchronous>, transform_indices = @transform_1, window_bounds = array<i64: 32, 96>}, {pipeline_mode = #tpu.pipeline_mode<synchronous>, transform_indices = @transform_2, window_bounds = array<i64: 1, 96>}, {pipeline_mode = #tpu.pipeline_mode<synchronous>, transform_indices = @transform_3, window_bounds = array<i64: 32, 32>}, {pipeline_mode = #tpu.pipeline_mode<synchronous>, transform_indices = @transform_4, window_bounds = array<i64: 1, 32>}, {transform_indices = @transform_5, window_bounds = array<i64: 1, 2, 256>}]} {
    %c0 = arith.constant 0 : index
    %c0_0 = arith.constant 0 : index
    %c0_1 = arith.constant 0 : index
    %0 = vector.load %arg1[%c0, %c0_0, %c0_1] : memref<1x16x32xf32, #tpu.memory_space<vmem>>, vector<1x16x32xf32>
    %1 = vector.shape_cast %0 : vector<1x16x32xf32> to vector<16x32xf32>
    %c0_2 = arith.constant 0 : index
    %c0_3 = arith.constant 0 : index
    %2 = vector.load %arg2[%c0_2, %c0_3] : memref<32x96xf32, #tpu.memory_space<vmem>>, vector<32x96xf32>
    %cst = arith.constant dense<0.000000e+00> : vector<16x96xf32>
    %3 = tpu.matmul %1, %2, %cst {dimension_numbers = #tpu.dot_dimension_numbers<[1], [0], [0], [1], [0, 0, 1, 1], [], []>} : vector<16x32xf32>, vector<32x96xf32>, vector<16x96xf32> -> vector<16x96xf32>
    %c0_4 = arith.constant 0 : index
    %c0_5 = arith.constant 0 : index
    %4 = vector.load %arg3[%c0_4, %c0_5] : memref<1x96xf32, #tpu.memory_space<vmem>>, vector<1x96xf32>
    %5 = vector.broadcast %4 : vector<1x96xf32> to vector<16x96xf32>
    %6 = arith.addf %3, %5 : vector<16x96xf32>
    %7 = vector.extract_strided_slice %6 {offsets = [0, 0], sizes = [16, 8], strides = [1, 1]} : vector<16x96xf32> to vector<16x8xf32>
    %cst_6 = arith.constant 0.353553385 : f32
    %8 = vector.broadcast %cst_6 : f32 to vector<16x8xf32>
    %9 = arith.mulf %7, %8 : vector<16x8xf32>
    %10 = vector.extract_strided_slice %6 {offsets = [0, 32], sizes = [16, 8], strides = [1, 1]} : vector<16x96xf32> to vector<16x8xf32>
    %11 = vector.extract_strided_slice %6 {offsets = [0, 64], sizes = [16, 8], strides = [1, 1]} : vector<16x96xf32> to vector<16x8xf32>
    %12 = vector.shape_cast %9 : vector<16x8xf32> to vector<2x8x8xf32>
    %13 = vector.shape_cast %10 : vector<16x8xf32> to vector<2x8x8xf32>
    %14 = vector.shape_cast %11 : vector<16x8xf32> to vector<2x8x8xf32>
    "tpu.trace_start"() <{level = 10 : i32, message = "bqd,bkd->bqk"}> : () -> ()
    %cst_7 = arith.constant dense<0.000000e+00> : vector<2x8x8xf32>
    %15 = tpu.matmul %12, %13, %cst_7 {dimension_numbers = #tpu.dot_dimension_numbers<[2], [2], [1], [1], [0, 0, 0, 1, 1, 1], [0], [0]>} : vector<2x8x8xf32>, vector<2x8x8xf32>, vector<2x8x8xf32> -> vector<2x8x8xf32>
    "tpu.trace_stop"() : () -> ()
    %cst_8 = arith.constant dense<0xFF800000> : vector<2x8xf32>
    %16 = vector.multi_reduction <maximumf>, %15, %cst_8 [2] : vector<2x8x8xf32> to vector<2x8xf32>
    %17 = vector.shape_cast %16 : vector<2x8xf32> to vector<2x8x1xf32>
    %18 = vector.broadcast %17 : vector<2x8x1xf32> to vector<2x8x8xf32>
    %19 = arith.subf %15, %18 : vector<2x8x8xf32>
    %20 = math.exp %19 : vector<2x8x8xf32>
    %cst_9 = arith.constant dense<0.000000e+00> : vector<2x8xf32>
    %21 = vector.multi_reduction <add>, %20, %cst_9 [2] : vector<2x8x8xf32> to vector<2x8xf32>
    %22 = vector.shape_cast %21 : vector<2x8xf32> to vector<2x8x1xf32>
    %23 = vector.broadcast %22 : vector<2x8x1xf32> to vector<2x8x8xf32>
    %24 = arith.divf %20, %23 : vector<2x8x8xf32>
    "tpu.trace_start"() <{level = 10 : i32, message = "bqk,bkd->bqd"}> : () -> ()
    %cst_10 = arith.constant dense<0.000000e+00> : vector<2x8x8xf32>
    %25 = tpu.matmul %24, %14, %cst_10 {dimension_numbers = #tpu.dot_dimension_numbers<[2], [1], [1], [2], [0, 0, 0, 1, 1, 2], [0], [0]>} : vector<2x8x8xf32>, vector<2x8x8xf32>, vector<2x8x8xf32> -> vector<2x8x8xf32>
    "tpu.trace_stop"() : () -> ()
    %26 = vector.shape_cast %25 : vector<2x8x8xf32> to vector<16x8xf32>
    %c0_11 = arith.constant 0 : index
    %c0_12 = arith.constant 0 : index
    %27 = vector.load %arg7[%c0_11, %c0_12] : memref<16x32xf32, #tpu.memory_space<vmem>>, vector<16x8xf32>
    tpu.vector_store %arg7[%c0_11, %c0_12], %26 {strides = array<i32>} : memref<16x32xf32, #tpu.memory_space<vmem>>, vector<16x8xf32>,
    %28 = vector.extract_strided_slice %6 {offsets = [0, 8], sizes = [16, 8], strides = [1, 1]} : vector<16x96xf32> to vector<16x8xf32>
    %cst_13 = arith.constant 0.353553385 : f32
    %29 = vector.broadcast %cst_13 : f32 to vector<16x8xf32>
    %30 = arith.mulf %28, %29 : vector<16x8xf32>
    %31 = vector.extract_strided_slice %6 {offsets = [0, 40], sizes = [16, 8], strides = [1, 1]} : vector<16x96xf32> to vector<16x8xf32>
    %32 = vector.extract_strided_slice %6 {offsets = [0, 72], sizes = [16, 8], strides = [1, 1]} : vector<16x96xf32> to vector<16x8xf32>
    %33 = vector.shape_cast %30 : vector<16x8xf32> to vector<2x8x8xf32>
    %34 = vector.shape_cast %31 : vector<16x8xf32> to vector<2x8x8xf32>
    %35 = vector.shape_cast %32 : vector<16x8xf32> to vector<2x8x8xf32>
    "tpu.trace_start"() <{level = 10 : i32, message = "bqd,bkd->bqk"}> : () -> ()
    %cst_14 = arith.constant dense<0.000000e+00> : vector<2x8x8xf32>
    %36 = tpu.matmul %33, %34, %cst_14 {dimension_numbers = #tpu.dot_dimension_numbers<[2], [2], [1], [1], [0, 0, 0, 1, 1, 1], [0], [0]>} : vector<2x8x8xf32>, vector<2x8x8xf32>, vector<2x8x8xf32> -> vector<2x8x8xf32>
    "tpu.trace_stop"() : () -> ()
    %cst_15 = arith.constant dense<0xFF800000> : vector<2x8xf32>
    %37 = vector.multi_reduction <maximumf>, %36, %cst_15 [2] : vector<2x8x8xf32> to vector<2x8xf32>
    %38 = vector.shape_cast %37 : vector<2x8xf32> to vector<2x8x1xf32>
    %39 = vector.broadcast %38 : vector<2x8x1xf32> to vector<2x8x8xf32>
    %40 = arith.subf %36, %39 : vector<2x8x8xf32>
    %41 = math.exp %40 : vector<2x8x8xf32>
    %cst_16 = arith.constant dense<0.000000e+00> : vector<2x8xf32>
    %42 = vector.multi_reduction <add>, %41, %cst_16 [2] : vector<2x8x8xf32> to vector<2x8xf32>
    %43 = vector.shape_cast %42 : vector<2x8xf32> to vector<2x8x1xf32>
    %44 = vector.broadcast %43 : vector<2x8x1xf32> to vector<2x8x8xf32>
    %45 = arith.divf %41, %44 : vector<2x8x8xf32>
    "tpu.trace_start"() <{level = 10 : i32, message = "bqk,bkd->bqd"}> : () -> ()
    %cst_17 = arith.constant dense<0.000000e+00> : vector<2x8x8xf32>
    %46 = tpu.matmul %45, %35, %cst_17 {dimension_numbers = #tpu.dot_dimension_numbers<[2], [1], [1], [2], [0, 0, 0, 1, 1, 2], [0], [0]>} : vector<2x8x8xf32>, vector<2x8x8xf32>, vector<2x8x8xf32> -> vector<2x8x8xf32>
    "tpu.trace_stop"() : () -> ()
    %47 = vector.shape_cast %46 : vector<2x8x8xf32> to vector<16x8xf32>
    %c0_18 = arith.constant 0 : index
    %c8 = arith.constant 8 : index
    %48 = vector.load %arg7[%c0_18, %c8] : memref<16x32xf32, #tpu.memory_space<vmem>>, vector<16x8xf32>
    tpu.vector_store %arg7[%c0_18, %c8], %47 {strides = array<i32>} : memref<16x32xf32, #tpu.memory_space<vmem>>, vector<16x8xf32>,
    %49 = vector.extract_strided_slice %6 {offsets = [0, 16], sizes = [16, 8], strides = [1, 1]} : vector<16x96xf32> to vector<16x8xf32>
    %cst_19 = arith.constant 0.353553385 : f32
    %50 = vector.broadcast %cst_19 : f32 to vector<16x8xf32>
    %51 = arith.mulf %49, %50 : vector<16x8xf32>
    %52 = vector.extract_strided_slice %6 {offsets = [0, 48], sizes = [16, 8], strides = [1, 1]} : vector<16x96xf32> to vector<16x8xf32>
    %53 = vector.extract_strided_slice %6 {offsets = [0, 80], sizes = [16, 8], strides = [1, 1]} : vector<16x96xf32> to vector<16x8xf32>
    %54 = vector.shape_cast %51 : vector<16x8xf32> to vector<2x8x8xf32>
    %55 = vector.shape_cast %52 : vector<16x8xf32> to vector<2x8x8xf32>
    %56 = vector.shape_cast %53 : vector<16x8xf32> to vector<2x8x8xf32>
    "tpu.trace_start"() <{level = 10 : i32, message = "bqd,bkd->bqk"}> : () -> ()
    %cst_20 = arith.constant dense<0.000000e+00> : vector<2x8x8xf32>
    %57 = tpu.matmul %54, %55, %cst_20 {dimension_numbers = #tpu.dot_dimension_numbers<[2], [2], [1], [1], [0, 0, 0, 1, 1, 1], [0], [0]>} : vector<2x8x8xf32>, vector<2x8x8xf32>, vector<2x8x8xf32> -> vector<2x8x8xf32>
    "tpu.trace_stop"() : () -> ()
    %cst_21 = arith.constant dense<0xFF800000> : vector<2x8xf32>
    %58 = vector.multi_reduction <maximumf>, %57, %cst_21 [2] : vector<2x8x8xf32> to vector<2x8xf32>
    %59 = vector.shape_cast %58 : vector<2x8xf32> to vector<2x8x1xf32>
    %60 = vector.broadcast %59 : vector<2x8x1xf32> to vector<2x8x8xf32>
    %61 = arith.subf %57, %60 : vector<2x8x8xf32>
    %62 = math.exp %61 : vector<2x8x8xf32>
    %cst_22 = arith.constant dense<0.000000e+00> : vector<2x8xf32>
    %63 = vector.multi_reduction <add>, %62, %cst_22 [2] : vector<2x8x8xf32> to vector<2x8xf32>
    %64 = vector.shape_cast %63 : vector<2x8xf32> to vector<2x8x1xf32>
    %65 = vector.broadcast %64 : vector<2x8x1xf32> to vector<2x8x8xf32>
    %66 = arith.divf %62, %65 : vector<2x8x8xf32>
    "tpu.trace_start"() <{level = 10 : i32, message = "bqk,bkd->bqd"}> : () -> ()
    %cst_23 = arith.constant dense<0.000000e+00> : vector<2x8x8xf32>
    %67 = tpu.matmul %66, %56, %cst_23 {dimension_numbers = #tpu.dot_dimension_numbers<[2], [1], [1], [2], [0, 0, 0, 1, 1, 2], [0], [0]>} : vector<2x8x8xf32>, vector<2x8x8xf32>, vector<2x8x8xf32> -> vector<2x8x8xf32>
    "tpu.trace_stop"() : () -> ()
    %68 = vector.shape_cast %67 : vector<2x8x8xf32> to vector<16x8xf32>
    %c0_24 = arith.constant 0 : index
    %c16 = arith.constant 16 : index
    %69 = vector.load %arg7[%c0_24, %c16] : memref<16x32xf32, #tpu.memory_space<vmem>>, vector<16x8xf32>
    tpu.vector_store %arg7[%c0_24, %c16], %68 {strides = array<i32>} : memref<16x32xf32, #tpu.memory_space<vmem>>, vector<16x8xf32>,
    %70 = vector.extract_strided_slice %6 {offsets = [0, 24], sizes = [16, 8], strides = [1, 1]} : vector<16x96xf32> to vector<16x8xf32>
    %cst_25 = arith.constant 0.353553385 : f32
    %71 = vector.broadcast %cst_25 : f32 to vector<16x8xf32>
    %72 = arith.mulf %70, %71 : vector<16x8xf32>
    %73 = vector.extract_strided_slice %6 {offsets = [0, 56], sizes = [16, 8], strides = [1, 1]} : vector<16x96xf32> to vector<16x8xf32>
    %74 = vector.extract_strided_slice %6 {offsets = [0, 88], sizes = [16, 8], strides = [1, 1]} : vector<16x96xf32> to vector<16x8xf32>
    %75 = vector.shape_cast %72 : vector<16x8xf32> to vector<2x8x8xf32>
    %76 = vector.shape_cast %73 : vector<16x8xf32> to vector<2x8x8xf32>
    %77 = vector.shape_cast %74 : vector<16x8xf32> to vector<2x8x8xf32>
    "tpu.trace_start"() <{level = 10 : i32, message = "bqd,bkd->bqk"}> : () -> ()
    %cst_26 = arith.constant dense<0.000000e+00> : vector<2x8x8xf32>
    %78 = tpu.matmul %75, %76, %cst_26 {dimension_numbers = #tpu.dot_dimension_numbers<[2], [2], [1], [1], [0, 0, 0, 1, 1, 1], [0], [0]>} : vector<2x8x8xf32>, vector<2x8x8xf32>, vector<2x8x8xf32> -> vector<2x8x8xf32>
    "tpu.trace_stop"() : () -> ()
    %cst_27 = arith.constant dense<0xFF800000> : vector<2x8xf32>
    %79 = vector.multi_reduction <maximumf>, %78, %cst_27 [2] : vector<2x8x8xf32> to vector<2x8xf32>
    %80 = vector.shape_cast %79 : vector<2x8xf32> to vector<2x8x1xf32>
    %81 = vector.broadcast %80 : vector<2x8x1xf32> to vector<2x8x8xf32>
    %82 = arith.subf %78, %81 : vector<2x8x8xf32>
    %83 = math.exp %82 : vector<2x8x8xf32>
    %cst_28 = arith.constant dense<0.000000e+00> : vector<2x8xf32>
    %84 = vector.multi_reduction <add>, %83, %cst_28 [2] : vector<2x8x8xf32> to vector<2x8xf32>
    %85 = vector.shape_cast %84 : vector<2x8xf32> to vector<2x8x1xf32>
    %86 = vector.broadcast %85 : vector<2x8x1xf32> to vector<2x8x8xf32>
    %87 = arith.divf %83, %86 : vector<2x8x8xf32>
    "tpu.trace_start"() <{level = 10 : i32, message = "bqk,bkd->bqd"}> : () -> ()
    %cst_29 = arith.constant dense<0.000000e+00> : vector<2x8x8xf32>
    %88 = tpu.matmul %87, %77, %cst_29 {dimension_numbers = #tpu.dot_dimension_numbers<[2], [1], [1], [2], [0, 0, 0, 1, 1, 2], [0], [0]>} : vector<2x8x8xf32>, vector<2x8x8xf32>, vector<2x8x8xf32> -> vector<2x8x8xf32>
    "tpu.trace_stop"() : () -> ()
    %89 = vector.shape_cast %88 : vector<2x8x8xf32> to vector<16x8xf32>
    %c0_30 = arith.constant 0 : index
    %c24 = arith.constant 24 : index
    %90 = vector.load %arg7[%c0_30, %c24] : memref<16x32xf32, #tpu.memory_space<vmem>>, vector<16x8xf32>
    tpu.vector_store %arg7[%c0_30, %c24], %89 {strides = array<i32>} : memref<16x32xf32, #tpu.memory_space<vmem>>, vector<16x8xf32>,
    %c0_31 = arith.constant 0 : index
    %c0_32 = arith.constant 0 : index
    %91 = vector.load %arg7[%c0_31, %c0_32] : memref<16x32xf32, #tpu.memory_space<vmem>>, vector<16x32xf32>
    %c0_33 = arith.constant 0 : index
    %c0_34 = arith.constant 0 : index
    %92 = vector.load %arg4[%c0_33, %c0_34] : memref<32x32xf32, #tpu.memory_space<vmem>>, vector<32x32xf32>
    %cst_35 = arith.constant dense<0.000000e+00> : vector<16x32xf32>
    %93 = tpu.matmul %91, %92, %cst_35 {dimension_numbers = #tpu.dot_dimension_numbers<[1], [0], [0], [1], [0, 0, 1, 1], [], []>} : vector<16x32xf32>, vector<32x32xf32>, vector<16x32xf32> -> vector<16x32xf32>
    %c0_36 = arith.constant 0 : index
    %c0_37 = arith.constant 0 : index
    %94 = vector.load %arg5[%c0_36, %c0_37] : memref<1x32xf32, #tpu.memory_space<vmem>>, vector<1x32xf32>
    %95 = vector.broadcast %94 : vector<1x32xf32> to vector<16x32xf32>
    %96 = arith.addf %93, %95 : vector<16x32xf32>
    %97 = vector.shape_cast %96 : vector<16x32xf32> to vector<2x256xf32>
    %c0_38 = arith.constant 0 : index
    %c0_39 = arith.constant 0 : index
    %c0_40 = arith.constant 0 : index
    %98 = vector.load %arg6[%c0_38, %c0_39, %c0_40] : memref<1x2x256xf32, #tpu.memory_space<vmem>>, vector<1x2x256xf32>
    %99 = vector.shape_cast %98 : vector<1x2x256xf32> to vector<2x256xf32>
    %100 = vector.shape_cast %97 : vector<2x256xf32> to vector<1x2x256xf32>
    tpu.vector_store %arg6[%c0_38, %c0_39, %c0_40], %100 {strides = array<i32>} : memref<1x2x256xf32, #tpu.memory_space<vmem>>, vector<1x2x256xf32>,
    return
  }
  func.func @transform_0(%arg0: i32) -> (i32, i32, i32) {
    %c0_i32 = arith.constant 0 : i32
    %c0_i32_0 = arith.constant 0 : i32
    %c0_i32_1 = arith.constant 0 : i32
    return %arg0, %c0_i32, %c0_i32_0 : i32, i32, i32
  }
  func.func @transform_1(%arg0: i32) -> (i32, i32) {
    %c0_i32 = arith.constant 0 : i32
    %c0_i32_0 = arith.constant 0 : i32
    %c0_i32_1 = arith.constant 0 : i32
    return %c0_i32, %c0_i32_0 : i32, i32
  }
  func.func @transform_2(%arg0: i32) -> (i32, i32) {
    %c0_i32 = arith.constant 0 : i32
    %c0_i32_0 = arith.constant 0 : i32
    %c0_i32_1 = arith.constant 0 : i32
    return %c0_i32, %c0_i32_0 : i32, i32
  }
  func.func @transform_3(%arg0: i32) -> (i32, i32) {
    %c0_i32 = arith.constant 0 : i32
    %c0_i32_0 = arith.constant 0 : i32
    %c0_i32_1 = arith.constant 0 : i32
    return %c0_i32, %c0_i32_0 : i32, i32
  }
  func.func @transform_4(%arg0: i32) -> (i32, i32) {
    %c0_i32 = arith.constant 0 : i32
    %c0_i32_0 = arith.constant 0 : i32
    %c0_i32_1 = arith.constant 0 : i32
    return %c0_i32, %c0_i32_0 : i32, i32
  }
  func.func @transform_5(%arg0: i32) -> (i32, i32, i32) {
    %c0_i32 = arith.constant 0 : i32
    %c0_i32_0 = arith.constant 0 : i32
    %c0_i32_1 = arith.constant 0 : i32
    return %arg0, %c0_i32, %c0_i32_0 : i32, i32, i32
  }
}

module attributes {stable_mosaic.version = 11 : i64} {
  func.func @mha_kernel(%arg0: i32, %arg1: memref<1x16x32xf32, #tpu.memory_space<vmem>>, %arg2: memref<32x96xf32, #tpu.memory_space<vmem>>, %arg3: memref<1x96xf32, #tpu.memory_space<vmem>>, %arg4: memref<32x32xf32, #tpu.memory_space<vmem>>, %arg5: memref<1x32xf32, #tpu.memory_space<vmem>>, %arg6: memref<1x16x32xf32, #tpu.memory_space<vmem>>, %arg7: memref<16x32xf32, #tpu.memory_space<vmem>>) attributes {dimension_semantics = [#tpu.dimension_semantics<parallel>], iteration_bounds = array<i64: 1>, scalar_prefetch = 0 : i64, scratch_operands = 1 : i64, tpu.core_type = #tpu.core_type<tc>, window_params = [{transform_indices = @transform_0, window_bounds = array<i64: 1, 16, 32>}, {pipeline_mode = #tpu.pipeline_mode<synchronous>, transform_indices = @transform_1, window_bounds = array<i64: 32, 96>}, {pipeline_mode = #tpu.pipeline_mode<synchronous>, transform_indices = @transform_2, window_bounds = array<i64: 1, 96>}, {pipeline_mode = #tpu.pipeline_mode<synchronous>, transform_indices = @transform_3, window_bounds = array<i64: 32, 32>}, {pipeline_mode = #tpu.pipeline_mode<synchronous>, transform_indices = @transform_4, window_bounds = array<i64: 1, 32>}, {transform_indices = @transform_5, window_bounds = array<i64: 1, 16, 32>}]} {
    %c0 = arith.constant 0 : index
    %c0_0 = arith.constant 0 : index
    %c0_1 = arith.constant 0 : index
    %0 = vector.load %arg1[%c0, %c0_0, %c0_1] : memref<1x16x32xf32, #tpu.memory_space<vmem>>, vector<1x16x32xf32>
    %1 = vector.shape_cast %0 : vector<1x16x32xf32> to vector<16x32xf32>
    %c0_2 = arith.constant 0 : index
    %c0_3 = arith.constant 0 : index
    %2 = vector.load %arg2[%c0_2, %c0_3] : memref<32x96xf32, #tpu.memory_space<vmem>>, vector<32x96xf32>
    %cst = arith.constant dense<0.000000e+00> : vector<16x96xf32>
    %3 = tpu.matmul %1, %2, %cst {dimension_numbers = #tpu.dot_dimension_numbers<[1], [0], [0], [1], [0, 0, 1, 1], [], []>} : vector<16x32xf32>, vector<32x96xf32>, vector<16x96xf32> -> vector<16x96xf32>
    %c0_4 = arith.constant 0 : index
    %c0_5 = arith.constant 0 : index
    %4 = vector.load %arg3[%c0_4, %c0_5] : memref<1x96xf32, #tpu.memory_space<vmem>>, vector<1x96xf32>
    %5 = vector.broadcast %4 : vector<1x96xf32> to vector<16x96xf32>
    %6 = arith.addf %3, %5 : vector<16x96xf32>
    %7 = vector.extract_strided_slice %6 {offsets = [0, 0], sizes = [16, 8], strides = [1, 1]} : vector<16x96xf32> to vector<16x8xf32>
    %cst_6 = arith.constant 0.353553385 : f32
    %8 = vector.broadcast %cst_6 : f32 to vector<16x8xf32>
    %9 = arith.mulf %7, %8 : vector<16x8xf32>
    %10 = vector.extract_strided_slice %6 {offsets = [0, 32], sizes = [16, 8], strides = [1, 1]} : vector<16x96xf32> to vector<16x8xf32>
    %11 = vector.extract_strided_slice %6 {offsets = [0, 64], sizes = [16, 8], strides = [1, 1]} : vector<16x96xf32> to vector<16x8xf32>
    %12 = vector.shape_cast %9 : vector<16x8xf32> to vector<2x8x8xf32>
    %13 = vector.shape_cast %10 : vector<16x8xf32> to vector<2x8x8xf32>
    %14 = vector.shape_cast %11 : vector<16x8xf32> to vector<2x8x8xf32>
    "tpu.trace_start"() <{level = 10 : i32, message = "bqd,bkd->bqk"}> : () -> ()
    %cst_7 = arith.constant dense<0.000000e+00> : vector<2x8x8xf32>
    %15 = tpu.matmul %12, %13, %cst_7 {dimension_numbers = #tpu.dot_dimension_numbers<[2], [2], [1], [1], [0, 0, 0, 1, 1, 1], [0], [0]>} : vector<2x8x8xf32>, vector<2x8x8xf32>, vector<2x8x8xf32> -> vector<2x8x8xf32>
    "tpu.trace_stop"() : () -> ()
    %cst_8 = arith.constant dense<0xFF800000> : vector<2x8xf32>
    %16 = vector.multi_reduction <maximumf>, %15, %cst_8 [2] : vector<2x8x8xf32> to vector<2x8xf32>
    %17 = vector.shape_cast %16 : vector<2x8xf32> to vector<2x8x1xf32>
    %18 = vector.broadcast %17 : vector<2x8x1xf32> to vector<2x8x8xf32>
    %19 = arith.subf %15, %18 : vector<2x8x8xf32>
    %20 = math.exp %19 : vector<2x8x8xf32>
    %cst_9 = arith.constant dense<0.000000e+00> : vector<2x8xf32>
    %21 = vector.multi_reduction <add>, %20, %cst_9 [2] : vector<2x8x8xf32> to vector<2x8xf32>
    %22 = vector.shape_cast %21 : vector<2x8xf32> to vector<2x8x1xf32>
    %23 = vector.broadcast %22 : vector<2x8x1xf32> to vector<2x8x8xf32>
    %24 = arith.divf %20, %23 : vector<2x8x8xf32>
    "tpu.trace_start"() <{level = 10 : i32, message = "bqk,bkd->bqd"}> : () -> ()
    %cst_10 = arith.constant dense<0.000000e+00> : vector<2x8x8xf32>
    %25 = tpu.matmul %24, %14, %cst_10 {dimension_numbers = #tpu.dot_dimension_numbers<[2], [1], [1], [2], [0, 0, 0, 1, 1, 2], [0], [0]>} : vector<2x8x8xf32>, vector<2x8x8xf32>, vector<2x8x8xf32> -> vector<2x8x8xf32>
    "tpu.trace_stop"() : () -> ()
    %26 = vector.shape_cast %25 : vector<2x8x8xf32> to vector<16x8xf32>
    %c0_11 = arith.constant 0 : index
    %c0_12 = arith.constant 0 : index
    %27 = vector.load %arg7[%c0_11, %c0_12] : memref<16x32xf32, #tpu.memory_space<vmem>>, vector<16x8xf32>
    tpu.vector_store %arg7[%c0_11, %c0_12], %26 {strides = array<i32>} : memref<16x32xf32, #tpu.memory_space<vmem>>, vector<16x8xf32>,
    %28 = vector.extract_strided_slice %6 {offsets = [0, 8], sizes = [16, 8], strides = [1, 1]} : vector<16x96xf32> to vector<16x8xf32>
    %cst_13 = arith.constant 0.353553385 : f32
    %29 = vector.broadcast %cst_13 : f32 to vector<16x8xf32>
    %30 = arith.mulf %28, %29 : vector<16x8xf32>
    %31 = vector.extract_strided_slice %6 {offsets = [0, 40], sizes = [16, 8], strides = [1, 1]} : vector<16x96xf32> to vector<16x8xf32>
    %32 = vector.extract_strided_slice %6 {offsets = [0, 72], sizes = [16, 8], strides = [1, 1]} : vector<16x96xf32> to vector<16x8xf32>
    %33 = vector.shape_cast %30 : vector<16x8xf32> to vector<2x8x8xf32>
    %34 = vector.shape_cast %31 : vector<16x8xf32> to vector<2x8x8xf32>
    %35 = vector.shape_cast %32 : vector<16x8xf32> to vector<2x8x8xf32>
    "tpu.trace_start"() <{level = 10 : i32, message = "bqd,bkd->bqk"}> : () -> ()
    %cst_14 = arith.constant dense<0.000000e+00> : vector<2x8x8xf32>
    %36 = tpu.matmul %33, %34, %cst_14 {dimension_numbers = #tpu.dot_dimension_numbers<[2], [2], [1], [1], [0, 0, 0, 1, 1, 1], [0], [0]>} : vector<2x8x8xf32>, vector<2x8x8xf32>, vector<2x8x8xf32> -> vector<2x8x8xf32>
    "tpu.trace_stop"() : () -> ()
    %cst_15 = arith.constant dense<0xFF800000> : vector<2x8xf32>
    %37 = vector.multi_reduction <maximumf>, %36, %cst_15 [2] : vector<2x8x8xf32> to vector<2x8xf32>
    %38 = vector.shape_cast %37 : vector<2x8xf32> to vector<2x8x1xf32>
    %39 = vector.broadcast %38 : vector<2x8x1xf32> to vector<2x8x8xf32>
    %40 = arith.subf %36, %39 : vector<2x8x8xf32>
    %41 = math.exp %40 : vector<2x8x8xf32>
    %cst_16 = arith.constant dense<0.000000e+00> : vector<2x8xf32>
    %42 = vector.multi_reduction <add>, %41, %cst_16 [2] : vector<2x8x8xf32> to vector<2x8xf32>
    %43 = vector.shape_cast %42 : vector<2x8xf32> to vector<2x8x1xf32>
    %44 = vector.broadcast %43 : vector<2x8x1xf32> to vector<2x8x8xf32>
    %45 = arith.divf %41, %44 : vector<2x8x8xf32>
    "tpu.trace_start"() <{level = 10 : i32, message = "bqk,bkd->bqd"}> : () -> ()
    %cst_17 = arith.constant dense<0.000000e+00> : vector<2x8x8xf32>
    %46 = tpu.matmul %45, %35, %cst_17 {dimension_numbers = #tpu.dot_dimension_numbers<[2], [1], [1], [2], [0, 0, 0, 1, 1, 2], [0], [0]>} : vector<2x8x8xf32>, vector<2x8x8xf32>, vector<2x8x8xf32> -> vector<2x8x8xf32>
    "tpu.trace_stop"() : () -> ()
    %47 = vector.shape_cast %46 : vector<2x8x8xf32> to vector<16x8xf32>
    %c0_18 = arith.constant 0 : index
    %c8 = arith.constant 8 : index
    %48 = vector.load %arg7[%c0_18, %c8] : memref<16x32xf32, #tpu.memory_space<vmem>>, vector<16x8xf32>
    tpu.vector_store %arg7[%c0_18, %c8], %47 {strides = array<i32>} : memref<16x32xf32, #tpu.memory_space<vmem>>, vector<16x8xf32>,
    %49 = vector.extract_strided_slice %6 {offsets = [0, 16], sizes = [16, 8], strides = [1, 1]} : vector<16x96xf32> to vector<16x8xf32>
    %cst_19 = arith.constant 0.353553385 : f32
    %50 = vector.broadcast %cst_19 : f32 to vector<16x8xf32>
    %51 = arith.mulf %49, %50 : vector<16x8xf32>
    %52 = vector.extract_strided_slice %6 {offsets = [0, 48], sizes = [16, 8], strides = [1, 1]} : vector<16x96xf32> to vector<16x8xf32>
    %53 = vector.extract_strided_slice %6 {offsets = [0, 80], sizes = [16, 8], strides = [1, 1]} : vector<16x96xf32> to vector<16x8xf32>
    %54 = vector.shape_cast %51 : vector<16x8xf32> to vector<2x8x8xf32>
    %55 = vector.shape_cast %52 : vector<16x8xf32> to vector<2x8x8xf32>
    %56 = vector.shape_cast %53 : vector<16x8xf32> to vector<2x8x8xf32>
    "tpu.trace_start"() <{level = 10 : i32, message = "bqd,bkd->bqk"}> : () -> ()
    %cst_20 = arith.constant dense<0.000000e+00> : vector<2x8x8xf32>
    %57 = tpu.matmul %54, %55, %cst_20 {dimension_numbers = #tpu.dot_dimension_numbers<[2], [2], [1], [1], [0, 0, 0, 1, 1, 1], [0], [0]>} : vector<2x8x8xf32>, vector<2x8x8xf32>, vector<2x8x8xf32> -> vector<2x8x8xf32>
    "tpu.trace_stop"() : () -> ()
    %cst_21 = arith.constant dense<0xFF800000> : vector<2x8xf32>
    %58 = vector.multi_reduction <maximumf>, %57, %cst_21 [2] : vector<2x8x8xf32> to vector<2x8xf32>
    %59 = vector.shape_cast %58 : vector<2x8xf32> to vector<2x8x1xf32>
    %60 = vector.broadcast %59 : vector<2x8x1xf32> to vector<2x8x8xf32>
    %61 = arith.subf %57, %60 : vector<2x8x8xf32>
    %62 = math.exp %61 : vector<2x8x8xf32>
    %cst_22 = arith.constant dense<0.000000e+00> : vector<2x8xf32>
    %63 = vector.multi_reduction <add>, %62, %cst_22 [2] : vector<2x8x8xf32> to vector<2x8xf32>
    %64 = vector.shape_cast %63 : vector<2x8xf32> to vector<2x8x1xf32>
    %65 = vector.broadcast %64 : vector<2x8x1xf32> to vector<2x8x8xf32>
    %66 = arith.divf %62, %65 : vector<2x8x8xf32>
    "tpu.trace_start"() <{level = 10 : i32, message = "bqk,bkd->bqd"}> : () -> ()
    %cst_23 = arith.constant dense<0.000000e+00> : vector<2x8x8xf32>
    %67 = tpu.matmul %66, %56, %cst_23 {dimension_numbers = #tpu.dot_dimension_numbers<[2], [1], [1], [2], [0, 0, 0, 1, 1, 2], [0], [0]>} : vector<2x8x8xf32>, vector<2x8x8xf32>, vector<2x8x8xf32> -> vector<2x8x8xf32>
    "tpu.trace_stop"() : () -> ()
    %68 = vector.shape_cast %67 : vector<2x8x8xf32> to vector<16x8xf32>
    %c0_24 = arith.constant 0 : index
    %c16 = arith.constant 16 : index
    %69 = vector.load %arg7[%c0_24, %c16] : memref<16x32xf32, #tpu.memory_space<vmem>>, vector<16x8xf32>
    tpu.vector_store %arg7[%c0_24, %c16], %68 {strides = array<i32>} : memref<16x32xf32, #tpu.memory_space<vmem>>, vector<16x8xf32>,
    %70 = vector.extract_strided_slice %6 {offsets = [0, 24], sizes = [16, 8], strides = [1, 1]} : vector<16x96xf32> to vector<16x8xf32>
    %cst_25 = arith.constant 0.353553385 : f32
    %71 = vector.broadcast %cst_25 : f32 to vector<16x8xf32>
    %72 = arith.mulf %70, %71 : vector<16x8xf32>
    %73 = vector.extract_strided_slice %6 {offsets = [0, 56], sizes = [16, 8], strides = [1, 1]} : vector<16x96xf32> to vector<16x8xf32>
    %74 = vector.extract_strided_slice %6 {offsets = [0, 88], sizes = [16, 8], strides = [1, 1]} : vector<16x96xf32> to vector<16x8xf32>
    %75 = vector.shape_cast %72 : vector<16x8xf32> to vector<2x8x8xf32>
    %76 = vector.shape_cast %73 : vector<16x8xf32> to vector<2x8x8xf32>
    %77 = vector.shape_cast %74 : vector<16x8xf32> to vector<2x8x8xf32>
    "tpu.trace_start"() <{level = 10 : i32, message = "bqd,bkd->bqk"}> : () -> ()
    %cst_26 = arith.constant dense<0.000000e+00> : vector<2x8x8xf32>
    %78 = tpu.matmul %75, %76, %cst_26 {dimension_numbers = #tpu.dot_dimension_numbers<[2], [2], [1], [1], [0, 0, 0, 1, 1, 1], [0], [0]>} : vector<2x8x8xf32>, vector<2x8x8xf32>, vector<2x8x8xf32> -> vector<2x8x8xf32>
    "tpu.trace_stop"() : () -> ()
    %cst_27 = arith.constant dense<0xFF800000> : vector<2x8xf32>
    %79 = vector.multi_reduction <maximumf>, %78, %cst_27 [2] : vector<2x8x8xf32> to vector<2x8xf32>
    %80 = vector.shape_cast %79 : vector<2x8xf32> to vector<2x8x1xf32>
    %81 = vector.broadcast %80 : vector<2x8x1xf32> to vector<2x8x8xf32>
    %82 = arith.subf %78, %81 : vector<2x8x8xf32>
    %83 = math.exp %82 : vector<2x8x8xf32>
    %cst_28 = arith.constant dense<0.000000e+00> : vector<2x8xf32>
    %84 = vector.multi_reduction <add>, %83, %cst_28 [2] : vector<2x8x8xf32> to vector<2x8xf32>
    %85 = vector.shape_cast %84 : vector<2x8xf32> to vector<2x8x1xf32>
    %86 = vector.broadcast %85 : vector<2x8x1xf32> to vector<2x8x8xf32>
    %87 = arith.divf %83, %86 : vector<2x8x8xf32>
    "tpu.trace_start"() <{level = 10 : i32, message = "bqk,bkd->bqd"}> : () -> ()
    %cst_29 = arith.constant dense<0.000000e+00> : vector<2x8x8xf32>
    %88 = tpu.matmul %87, %77, %cst_29 {dimension_numbers = #tpu.dot_dimension_numbers<[2], [1], [1], [2], [0, 0, 0, 1, 1, 2], [0], [0]>} : vector<2x8x8xf32>, vector<2x8x8xf32>, vector<2x8x8xf32> -> vector<2x8x8xf32>
    "tpu.trace_stop"() : () -> ()
    %89 = vector.shape_cast %88 : vector<2x8x8xf32> to vector<16x8xf32>
    %c0_30 = arith.constant 0 : index
    %c24 = arith.constant 24 : index
    %90 = vector.load %arg7[%c0_30, %c24] : memref<16x32xf32, #tpu.memory_space<vmem>>, vector<16x8xf32>
    tpu.vector_store %arg7[%c0_30, %c24], %89 {strides = array<i32>} : memref<16x32xf32, #tpu.memory_space<vmem>>, vector<16x8xf32>,
    %c0_31 = arith.constant 0 : index
    %c0_32 = arith.constant 0 : index
    %91 = vector.load %arg7[%c0_31, %c0_32] : memref<16x32xf32, #tpu.memory_space<vmem>>, vector<16x32xf32>
    %c0_33 = arith.constant 0 : index
    %c0_34 = arith.constant 0 : index
    %92 = vector.load %arg4[%c0_33, %c0_34] : memref<32x32xf32, #tpu.memory_space<vmem>>, vector<32x32xf32>
    %cst_35 = arith.constant dense<0.000000e+00> : vector<16x32xf32>
    %93 = tpu.matmul %91, %92, %cst_35 {dimension_numbers = #tpu.dot_dimension_numbers<[1], [0], [0], [1], [0, 0, 1, 1], [], []>} : vector<16x32xf32>, vector<32x32xf32>, vector<16x32xf32> -> vector<16x32xf32>
    %c0_36 = arith.constant 0 : index
    %c0_37 = arith.constant 0 : index
    %94 = vector.load %arg5[%c0_36, %c0_37] : memref<1x32xf32, #tpu.memory_space<vmem>>, vector<1x32xf32>
    %95 = vector.broadcast %94 : vector<1x32xf32> to vector<16x32xf32>
    %96 = arith.addf %93, %95 : vector<16x32xf32>
    %c0_38 = arith.constant 0 : index
    %c0_39 = arith.constant 0 : index
    %c0_40 = arith.constant 0 : index
    %97 = vector.load %arg6[%c0_38, %c0_39, %c0_40] : memref<1x16x32xf32, #tpu.memory_space<vmem>>, vector<1x16x32xf32>
    %98 = vector.shape_cast %97 : vector<1x16x32xf32> to vector<16x32xf32>
    %99 = vector.shape_cast %96 : vector<16x32xf32> to vector<1x16x32xf32>
    tpu.vector_store %arg6[%c0_38, %c0_39, %c0_40], %99 {strides = array<i32>} : memref<1x16x32xf32, #tpu.memory_space<vmem>>, vector<1x16x32xf32>,
    return
  }
  func.func @transform_0(%arg0: i32) -> (i32, i32, i32) {
    %c0_i32 = arith.constant 0 : i32
    %c0_i32_0 = arith.constant 0 : i32
    %c0_i32_1 = arith.constant 0 : i32
    return %arg0, %c0_i32, %c0_i32_0 : i32, i32, i32
  }
  func.func @transform_1(%arg0: i32) -> (i32, i32) {
    %c0_i32 = arith.constant 0 : i32
    %c0_i32_0 = arith.constant 0 : i32
    %c0_i32_1 = arith.constant 0 : i32
    return %c0_i32, %c0_i32_0 : i32, i32
  }
  func.func @transform_2(%arg0: i32) -> (i32, i32) {
    %c0_i32 = arith.constant 0 : i32
    %c0_i32_0 = arith.constant 0 : i32
    %c0_i32_1 = arith.constant 0 : i32
    return %c0_i32, %c0_i32_0 : i32, i32
  }
  func.func @transform_3(%arg0: i32) -> (i32, i32) {
    %c0_i32 = arith.constant 0 : i32
    %c0_i32_0 = arith.constant 0 : i32
    %c0_i32_1 = arith.constant 0 : i32
    return %c0_i32, %c0_i32_0 : i32, i32
  }
  func.func @transform_4(%arg0: i32) -> (i32, i32) {
    %c0_i32 = arith.constant 0 : i32
    %c0_i32_0 = arith.constant 0 : i32
    %c0_i32_1 = arith.constant 0 : i32
    return %c0_i32, %c0_i32_0 : i32, i32
  }
  func.func @transform_5(%arg0: i32) -> (i32, i32, i32) {
    %c0_i32 = arith.constant 0 : i32
    %c0_i32_0 = arith.constant 0 : i32
    %c0_i32_1 = arith.constant 0 : i32
    return %arg0, %c0_i32, %c0_i32_0 : i32, i32, i32
  }
}

</mosaic_0001>

<bundles_post_ra>
// kernel: tpu_custom_call.1
= control target key start
LH: loop header
LB: loop body
LE: loop exit
PB: predicated region body
PF: predicated region fallthrough
CT: control target
= control target key end

     0   :  { %10 = vsyncpa [#allocation4], 0  ;;  %s2232_s0 = inlined_call_operand.hbm [shape: f32[1,16,32], index: 0, kind: input, shape index: {}]   ;;  %s2233_s1 = inlined_call_operand.hbm [shape: f32[32,96], index: 1, kind: input, shape index: {}]   ;;  %s2234_s2 = inlined_call_operand.vmem [shape: f32[1,96], index: 2, kind: input, shape index: {}]   ;;  %s2235_s3 = inlined_call_operand.hbm [shape: f32[32,32], index: 3, kind: input, shape index: {}]   ;;  %s2236_s4 = inlined_call_operand.vmem [shape: f32[1,32], index: 4, kind: input, shape index: {}]   ;;  %s2237_s5 = inlined_call_operand.hbm [shape: f32[1,16,32], index: 5, kind: output, shape index: {}]  }
   0x1   :  { %11 = vsyncpa [#allocation7], 0 }
   0x2   :  { %12 = vsyncpa [#allocation5], 0  ;;  %s1968_s18 = smov [#allocation6]   ;;  %s1969_s20 = smov [#allocation3]  }
   0x3   :  { %s30_s19 = sshll.u32 %s1968_s18, 4  ;;  %s18_s21 = sshll.u32 %s1969_s20, 4  ;;  %s31_s19 = int_to_ptr.vmem [resolvable:$true] %s30_s19  ;;  %s2019_s21 = int_to_ptr.vmem [resolvable:$true] %s18_s21 }
   0x4   :  { %s1874_s24 = scalar_lea.hbm %s2233_s1, 512 }
   0x5   :  { %p1875_p0 = scmp.ne.s32.totalorder %s2233_s1, %s1874_s24  ;;  %p1878_p1 = scmp.lt.u32.totalorder %s1874_s24, %s2233_s1 }
   0x7   :  { %p1880_p2 = pnand %p1878_p1, %p1875_p0 }
   0x9   :  { %1883 = shalt.err (!%p1880_p2)
}
   0xa   :  { %s1884_s29 = scalar_lea.vmem %s31_s19, 512  ;;  %p1889_p4 = scmp.lt.s32.totalorder %s31_s19, %s31_s19 }
   0xb   :  { %p1885_p3 = scmp.ne.s32.totalorder %s31_s19, %s1884_s29  ;;  %p1890_p5 = scmp.lt.s32.totalorder %s1884_s29, %s1884_s29 }
   0xd   :  { %p1891_p6 = por %p1890_p5, %p1889_p4 }
   0xf   :  { %p1892_p7 = pnand %p1891_p6, %p1885_p3 }
  0x11   :  { %1895 = shalt.err (!%p1892_p7)
}
  0x12   :  { %s1970_s30 = smov 128   ;;  %s1971_s6 = smov 8  }
  0x13   :  { %36 = dma.hbm_to_vmem [thread:$0]  %s2233_s1, 512, %s31_s19, [#allocation7], %s1970_s30, %s1970_s30, %s1971_s6  }
  0x14   :  { %s1896_s11 = scalar_lea.hbm %s2232_s0, 256 }
  0x15   :  { %p1897_p8 = scmp.ne.s32.totalorder %s2232_s0, %s1896_s11  ;;  %p1900_p9 = scmp.lt.u32.totalorder %s1896_s11, %s2232_s0 }
  0x17   :  { %p1902_p10 = pnand %p1900_p9, %p1897_p8 }
  0x19   :  { %1905 = shalt.err (!%p1902_p10)
}
  0x1a   :  { %s1906_s16 = scalar_lea.vmem %s2019_s21, 256  ;;  %p1911_p12 = scmp.lt.s32.totalorder %s2019_s21, %s2019_s21 }
  0x1b   :  { %p1907_p11 = scmp.ne.s32.totalorder %s2019_s21, %s1906_s16  ;;  %p1912_p13 = scmp.lt.s32.totalorder %s1906_s16, %s1906_s16 }
  0x1d   :  { %p1913_p0 = por %p1912_p13, %p1911_p12 }
  0x1f   :  { %p1914_p1 = pnand %p1913_p0, %p1907_p11 }
  0x21   :  { %1917 = shalt.err (!%p1914_p1)
}
  0x22   :  { %24 = dma.hbm_to_vmem [thread:$0]  %s2232_s0, 256, %s2019_s21, [#allocation4], %s1970_s30, %s1970_s30, %s1971_s6  }
  0x23   :  { %s1972_s18 = smov [#allocation8]   ;;  %s1918_s23 = scalar_lea.hbm %s2235_s3, 512 }
  0x24   :  { %s44_s19 = sshll.u32 %s1972_s18, 4  ;;  %p1919_p2 = scmp.ne.s32.totalorder %s2235_s3, %s1918_s23  ;;  %s45_s19 = int_to_ptr.vmem [resolvable:$true] %s44_s19 }
  0x25   :  { %p1922_p3 = scmp.lt.u32.totalorder %s1918_s23, %s2235_s3 }
  0x27   :  { %p1924_p4 = pnand %p1922_p3, %p1919_p2 }
  0x29   :  { %1927 = shalt.err (!%p1924_p4)
}
  0x2a   :  { %s1928_s28 = scalar_lea.vmem %s45_s19, 512  ;;  %p1933_p6 = scmp.lt.s32.totalorder %s45_s19, %s45_s19 }
  0x2b   :  { %p1929_p5 = scmp.ne.s32.totalorder %s45_s19, %s1928_s28  ;;  %p1934_p7 = scmp.lt.s32.totalorder %s1928_s28, %s1928_s28 }
  0x2d   :  { %p1935_p8 = por %p1934_p7, %p1933_p6 }
  0x2f   :  { %p1936_p9 = pnand %p1935_p8, %p1929_p5 }
  0x31   :  { %1939 = shalt.err (!%p1936_p9)
}
  0x32   :  { %50 = dma.hbm_to_vmem [thread:$0]  %s2235_s3, 512, %s45_s19, [#allocation7], %s1970_s30, %s1970_s30, %s1971_s6  }
  0x33   :  { %1962 = dma.done.wait [#allocation4], 256  }
  0x34   :  { %1963 = vsyncadd [#allocation4], 4294967040 }
  0x35   :  { %1964 = dma.done.wait [#allocation7], 1024  }
  0x36   :  { %1965 = vsyncadd [#allocation7], 4294966272  ;;  %vm75_vm0 = vcmask 261120   ;;  %v64_v0 = vld [vmem:[#allocation6] sm:$0xff]  ;;  %v65_v1 = vld [vmem:[#allocation6 + $0x8] sm:$0xff]  ;;  %v1973_v8 = vmov 0.0  }
  0x37   :  { %v66_v2 = vld [vmem:[#allocation6 + $0x10] sm:$0xff]  ;;  %v1805_v3 = vpack.c.bf16 %v65_v1, %v64_v0  ;;  %v67_v4 = vld [vmem:[#allocation6 + $0x18] sm:$0xff]  ;;  %1714 = vmatprep.subr.mxu1 %v1973_v8  ;;  %vm1974_vm1 = vmmov 0   ;;  %v1629_v9 = vld [vmem:[%s2234_s2] ss:$0 sm:$0xff]  ;;  %s1975_s7 = smov 96  }
  0x38   :  { %v62_v5 = vld [vmem:[#allocation3] sm:$0xff]  ;;  %v1809_v6 = vpack.c.bf16 %v67_v4, %v66_v2  ;;  %v63_v7 = vld [vmem:[#allocation3 + $0x8] sm:$0xff]  ;;  %1716 = vmatprep.mubr.msk.f32.mxu1 %vm1974_vm1, %v1973_v8  ;;  %vm162_vm2 = vcmask 64512   ;;  %s1976_s2 = smov 64   ;;  %s1977_s8 = smov 88   ;;  %vm830_vm3 = vcmask 130112  }
  0x39   :  { %1711 = vmatprep.mubr.msk.f32.mxu0 %vm75_vm0, %v62_v5  ;;  %1806 = vmatprep.subr.bf16.mxu0 %v1805_v3  ;;  %s1978_s9 = smov 120   ;;  %s1979_s10 = smov 56   ;;  %vm1171_vm4 = vcmask 195712   ;;  %vm1512_vm5 = vcmask 261312  }
  0x3a   :  { %1808 = vmatpush3.bf16.msra.mxu0 %v1805_v3  ;;  %s1980_s11 = smov 112   ;;  %s1981_s12 = smov 80  }
  0x3b   :  { %1810 = vmatprep.subr.bf16.mxu0 %v1809_v6  ;;  %s1982_s13 = smov 48   ;;  %s1983_s14 = smov 72  }
  0x3c   :  { %s1984_s15 = smov 104   ;;  %s1985_s16 = smov 40  }
  0x3d   :  { %s1986_s1 = smov 16   ;;  %s1987_s17 = smov 24  }
  0x3e   :  { %1812 = vmatpush3.bf16.msra.mxu0 %v1809_v6  ;;  %s1988_s20 = smov [#allocation9]  }
  0x3f   :  { %1734 = vmatprep.subr.mxu0 %v1973_v8  ;;  %s1616_s22 = sshll.u32 %s1988_s20, 4  ;;  %s1617_s22 = int_to_ptr.vmem [resolvable:$true] %s1616_s22 }
  0x40   :  { %s1940_s23 = scalar_lea.vmem %s1617_s22, 256  ;;  %p1945_p11 = scmp.lt.s32.totalorder %s1617_s22, %s1617_s22 }
  0x41   :  { %1712 = vmatmul.mubr.msk.f32.vlgmr.msra.gmra.mrb[0].mxu0 %vm75_vm0, %v63_v7  ;;  %p1941_p10 = scmp.ne.s32.totalorder %s1617_s22, %s1940_s23  ;;  %p1946_p12 = scmp.lt.s32.totalorder %s1940_s23, %s1940_s23 }
  0x42   :  { %1736 = vmatprep.mubr.msk.f32.mxu0 %vm1974_vm1, %v1973_v8 }
  0x43   :  { %p1947_p13 = por %p1946_p12, %p1945_p11 }
  0x45   :  { %p1948_p0 = pnand %p1947_p13, %p1941_p10 }
 0x114   :  { %v1713_v10 = vpop.f32.mrb[0].mxu0 }
 0x115   :  { %v148_v11 = vpop.f32.mrb[1].mxu0  ;;  %v2085_v13 = vadd.f32 %v1713_v10, %v1629_v9 }
 0x116   :  { %v2082_v12 = vadd.f32 %v1629_v9, %v148_v11 }
 0x117   :  { %v2099_v17 = vmul.f32 0.35355338, %v2085_v13 }
 0x118   :  { %160 = vrot.lane.b32.xlu0 %v2082_v12, %s1975_s7  ;;  %v2091_v15 = vmul.f32 0.35355338, %v2082_v12 }
 0x11c   :  { %239 = vrot.lane.b32.xlu0 %v2085_v13, %s1975_s7 }
 0x18a   :  { %v161_v14 = vpop.permute.xlu0 %160 }
 0x18b   :  { %1715 = vmatpush3.xpose.msk.msra.mxu1 %vm162_vm2, %v161_v14 }
 0x18c   :  { %1719 = vmatprep.subr.mxu1 %v1973_v8 }
 0x18e   :  { %v240_v16 = vpop.permute.xlu0 %239  ;;  %1717 = vmatmul.mubr.msk.f32.vlgmr.msra.gmra.mrb[0].mxu1 %vm162_vm2, %v2091_v15 }
 0x18f   :  { %1720 = vmatpush3.xpose.msk.msra.mxu1 %vm162_vm2, %v240_v16  ;;  %1721 = vmatprep.mubr.msk.f32.mxu1 %vm1974_vm1, %v1973_v8 }
 0x190   :  { %1724 = vmatprep.subr.mxu1 %v1973_v8 }
 0x192   :  { %1722 = vmatmul.mubr.msk.f32.vlgmr.msra.gmra.mrb[2].mxu1 %vm162_vm2, %v2099_v17 }
 0x193   :  { %1726 = vmatprep.mubr.msk.f32.mxu1 %vm1974_vm1, %v1973_v8 }
 0x261   :  { %v234_v18 = vpop.f32.mrb[0].mxu1 }
 0x262   :  { %v1718_v19 = vpop.f32.mrb[1].mxu1  ;;  %v316_v20 = vsel %vm162_vm2, %v234_v18, -inf }
 0x263   :  { %317 = vmax.xlane.f32.xlu1 %v316_v20 }
 0x265   :  { %v312_v21 = vpop.f32.mrb[2].mxu1 }
 0x266   :  { %v1723_v22 = vpop.f32.mrb[3].mxu1  ;;  %v319_v23 = vsel %vm162_vm2, %v312_v21, -inf }
 0x267   :  { %320 = vmax.xlane.f32.xlu1 %v319_v23 }
 0x278   :  { %338 = vrot.lane.b32.xlu1 %v2082_v12, %s1976_s2 }
 0x27c   :  { %414 = vrot.lane.b32.xlu1 %v2085_v13, %s1976_s2 }
 0x280   :  { %494 = vrot.lane.b32.xlu1 %v2082_v12, %s1977_s8 }
 0x284   :  { %572 = vrot.lane.b32.xlu1 %v2085_v13, %s1977_s8 }
 0x2f0   :  { %v318_v24 = vpop.xlane.xlu1 %317 }
 0x2f1   :  { %v322_v25 = vsub.f32 %v234_v18, %v318_v24 }
 0x2f3   :  { %v324_v26 = vmul.f32 1.442695, %v322_v25 }
 0x2f4   :  { %v321_v27 = vpop.xlane.xlu1 %320 }
 0x2f5   :  { %1842 = vpow2.f32 %v324_v26  ;;  %v323_v28 = vsub.f32 %v312_v21, %v321_v27 }
 0x2f7   :  { %v326_v29 = vmul.f32 1.442695, %v323_v28 }
 0x2f8   :  { %v339_v30 = vpop.permute.xlu1 %338 }
 0x2f9   :  { %1844 = vpow2.f32 %v326_v29  ;;  %1725 = vmatpush3.msra.mxu1 %v339_v30 }
 0x2fa   :  { %1729 = vmatprep.subr.mxu1 %v1973_v8 }
 0x2fc   :  { %v415_v31 = vpop.permute.xlu1 %414 }
 0x2ff   :  { %v1843_v32 = vpop.eup %1842 }
 0x300   :  { %v495_v33 = vpop.permute.xlu1 %494  ;;  %v328_v34 = vsel %vm162_vm2, %v1843_v32, 0.0 }
 0x301   :  { %329 = vadd.xlane.f32.xlu0 %v328_v34  ;;  %1735 = vmatpush3.xpose.msk.msra.mxu0 %vm162_vm2, %v495_v33 }
 0x302   :  { %1744 = vmatprep.subr.mxu0 %v1973_v8 }
 0x303   :  { %v1845_v35 = vpop.eup %1844 }
 0x304   :  { %v331_v36 = vsel %vm162_vm2, %v1845_v35, 0.0  ;;  %v573_v37 = vpop.permute.xlu1 %572 }
 0x305   :  { %332 = vadd.xlane.f32.xlu1 %v331_v36 }
 0x316   :  { %570 = vrot.lane.b32.xlu1 %v2099_v17, %s1978_s9 }
 0x317   :  { %492 = vrot.lane.b32.xlu0 %v2091_v15, %s1978_s9 }
 0x38e   :  { %v330_v38 = vpop.xlane.xlu0 %329 }
 0x38f   :  { %1846 = vrcp.f32 %v330_v38 }
 0x392   :  { %v493_v39 = vpop.permute.xlu0 %492  ;;  %v333_v40 = vpop.xlane.xlu1 %332 }
 0x393   :  { %1848 = vrcp.f32 %v333_v40  ;;  %1737 = vmatmul.mubr.msk.f32.vlgmr.msra.gmra.mrb[2].mxu0 %vm162_vm2, %v493_v39 }
 0x394   :  { %1746 = vmatprep.mubr.msk.f32.mxu0 %vm1974_vm1, %v1973_v8 }
 0x396   :  { %v571_v45 = vpop.permute.xlu1 %570 }
 0x399   :  { %v1847_v41 = vpop.eup %1846 }
 0x39a   :  { %v335_v42 = vmul.f32 %v1847_v41, %v1843_v32 }
 0x39c   :  { %1727 = vmatmul.mubr.msk.f32.vlgmr.msra.gmra.mrb[4].mxu1 %vm162_vm2, %v335_v42 }
 0x39d   :  { %v1849_v43 = vpop.eup %1848  ;;  %1730 = vmatpush3.msra.mxu1 %v415_v31  ;;  %1731 = vmatprep.mubr.msk.f32.mxu1 %vm1974_vm1, %v1973_v8 }
 0x39e   :  { %v337_v44 = vmul.f32 %v1849_v43, %v1845_v35  ;;  %1739 = vmatprep.subr.mxu1 %v1973_v8 }
 0x3a0   :  { %1732 = vmatmul.mubr.msk.f32.vlgmr.msra.gmra.mrb[6].mxu1 %vm162_vm2, %v337_v44 }
 0x3a1   :  { %1741 = vmatprep.mubr.msk.f32.mxu1 %vm1974_vm1, %v1973_v8 }
 0x3a4   :  { %1740 = vmatpush3.xpose.msk.msra.mxu1 %vm162_vm2, %v573_v37 }
 0x3a5   :  { %1749 = vmatprep.subr.mxu1 %v1973_v8 }
 0x3a7   :  { %1742 = vmatmul.mubr.msk.f32.vlgmr.msra.gmra.mrb[8].mxu1 %vm162_vm2, %v571_v45 }
 0x3a8   :  { %1751 = vmatprep.mubr.msk.f32.mxu1 %vm1974_vm1, %v1973_v8 }
 0x466   :  { %v566_v46 = vpop.f32.mrb[2].mxu0 }
 0x467   :  { %v1738_v47 = vpop.f32.mrb[3].mxu0  ;;  %v648_v48 = vsel %vm162_vm2, %v566_v46, -inf }
 0x468   :  { %649 = vmax.xlane.f32.xlu1 %v648_v48 }
 0x46f   :  { %v410_v49 = vpop.f32.mrb[4].mxu1 }
 0x470   :  { %490 = vst.msk [vmem:[#allocation2] sm:$0xff] %vm162_vm2, %v410_v49  ;;  %v1728_v50 = vpop.f32.mrb[5].mxu1 }
 0x473   :  { %v486_v51 = vpop.f32.mrb[6].mxu1 }
 0x474   :  { %491 = vst.msk [vmem:[#allocation2 + $0x8] sm:$0xff] %vm162_vm2, %v486_v51  ;;  %v1733_v52 = vpop.f32.mrb[7].mxu1 }
 0x47a   :  { %v644_v53 = vpop.f32.mrb[8].mxu1 }
 0x47b   :  { %v1743_v54 = vpop.f32.mrb[9].mxu1  ;;  %v651_v55 = vsel %vm162_vm2, %v644_v53, -inf }
 0x47c   :  { %652 = vmax.xlane.f32.xlu0 %v651_v55 }
 0x492   :  { %746 = vrot.lane.b32.xlu0 %v2085_v13, %s1979_s10 }
 0x496   :  { %833 = vrot.lane.b32.xlu0 %v2091_v15, %s1980_s11 }
 0x4f5   :  { %v650_v56 = vpop.xlane.xlu1 %649 }
 0x4f6   :  { %v654_v57 = vsub.f32 %v566_v46, %v650_v56 }
 0x4f8   :  { %v656_v58 = vmul.f32 1.442695, %v654_v57 }
 0x4fa   :  { %1850 = vpow2.f32 %v656_v58 }
 0x504   :  { %v1851_v59 = vpop.eup %1850 }
 0x505   :  { %v660_v60 = vsel %vm162_vm2, %v1851_v59, 0.0 }
 0x506   :  { %661 = vadd.xlane.f32.xlu1 %v660_v60 }
 0x509   :  { %v653_v61 = vpop.xlane.xlu0 %652 }
 0x50a   :  { %v655_v63 = vsub.f32 %v644_v53, %v653_v61 }
 0x50c   :  { %v658_v0 = vmul.f32 1.442695, %v655_v63 }
 0x50d   :  { %v747_v62 = vpop.permute.xlu0 %746 }
 0x50e   :  { %1750 = vmatpush3.msra.mxu1 %v747_v62  ;;  %1852 = vpow2.f32 %v658_v0 }
 0x50f   :  { %1759 = vmatprep.subr.mxu1 %v1973_v8 }
 0x511   :  { %v834_v9 = vpop.permute.xlu0 %833 }
 0x517   :  { %670 = vrot.lane.b32.xlu1 %v2082_v12, %s1979_s10 }
 0x518   :  { %v1853_v1 = vpop.eup %1852 }
 0x519   :  { %v663_v2 = vsel %vm162_vm2, %v1853_v1, 0.0 }
 0x51b   :  { %835 = vrot.lane.b32.xlu1 %v2082_v12, %s1981_s12 }
 0x51f   :  { %913 = vrot.lane.b32.xlu1 %v2085_v13, %s1981_s12 }
 0x543   :  { %664 = vadd.xlane.f32.xlu1 %v663_v2 }
 0x554   :  { %911 = vrot.lane.b32.xlu1 %v2099_v17, %s1980_s11 }
 0x593   :  { %v662_v3 = vpop.xlane.xlu1 %661 }
 0x594   :  { %1854 = vrcp.f32 %v662_v3 }
 0x597   :  { %v671_v4 = vpop.permute.xlu1 %670 }
 0x598   :  { %1745 = vmatpush3.msra.mxu0 %v671_v4 }
 0x599   :  { %1754 = vmatprep.subr.mxu0 %v1973_v8 }
 0x59b   :  { %v836_v7 = vpop.permute.xlu1 %835 }
 0x59e   :  { %v1855_v5 = vpop.eup %1854 }
 0x59f   :  { %v667_v6 = vmul.f32 %v1855_v5, %v1851_v59  ;;  %v914_v10 = vpop.permute.xlu1 %913 }
 0x5a1   :  { %1747 = vmatmul.mubr.msk.f32.vlgmr.msra.gmra.mrb[4].mxu0 %vm162_vm2, %v667_v6 }
 0x5a2   :  { %1755 = vmatpush3.xpose.msk.msra.mxu0 %vm162_vm2, %v836_v7  ;;  %1756 = vmatprep.mubr.msk.f32.mxu0 %vm1974_vm1, %v1973_v8 }
 0x5a3   :  { %1764 = vmatprep.subr.mxu0 %v1973_v8 }
 0x5a5   :  { %1757 = vmatmul.mubr.msk.f32.vlgmr.msra.gmra.mrb[6].mxu0 %vm162_vm2, %v834_v9 }
 0x5a6   :  { %1766 = vmatprep.mubr.msk.f32.mxu0 %vm1974_vm1, %v1973_v8 }
 0x5d0   :  { %v665_v11 = vpop.xlane.xlu1 %664 }
 0x5d1   :  { %1856 = vrcp.f32 %v665_v11 }
 0x5d4   :  { %v912_v18 = vpop.permute.xlu1 %911 }
 0x5db   :  { %v1857_v14 = vpop.eup %1856 }
 0x5dc   :  { %v669_v16 = vmul.f32 %v1857_v14, %v1853_v1 }
 0x5de   :  { %1752 = vmatmul.mubr.msk.f32.vlgmr.msra.gmra.mrb[10].mxu1 %vm162_vm2, %v669_v16 }
 0x5df   :  { %1760 = vmatpush3.xpose.msk.msra.mxu1 %vm162_vm2, %v914_v10  ;;  %1761 = vmatprep.mubr.msk.f32.mxu1 %vm1974_vm1, %v1973_v8 }
 0x5e0   :  { %1769 = vmatprep.subr.mxu1 %v1973_v8 }
 0x5e2   :  { %1762 = vmatmul.mubr.msk.f32.vlgmr.msra.gmra.mrb[12].mxu1 %vm162_vm2, %v912_v18 }
 0x5e3   :  { %1771 = vmatprep.mubr.msk.f32.mxu1 %vm1974_vm1, %v1973_v8 }
 0x674   :  { %v2164_v19 = vpop.f32.mrb[4].mxu0 }
 0x675   :  { %v1748_v20 = vpop.f32.mrb[5].mxu0 }
 0x676   :  { %v1517_v20 = vld [vmem:[#allocation8] sm:$0xff] }
 0x678   :  { %v907_v21 = vpop.f32.mrb[6].mxu0 }
 0x679   :  { %v1758_v22 = vpop.f32.mrb[7].mxu0  ;;  %v989_v23 = vsel %vm162_vm2, %v907_v21, -inf }
 0x67a   :  { %990 = vmax.xlane.f32.xlu0 %v989_v23 }
 0x6b1   :  { %v2167_v24 = vpop.f32.mrb[10].mxu1 }
 0x6b2   :  { %v1753_v25 = vpop.f32.mrb[11].mxu1 }
 0x6b3   :  { %v1520_v25 = vld [vmem:[#allocation8 + $0x18] sm:$0xff] }
 0x6b5   :  { %v985_v26 = vpop.f32.mrb[12].mxu1 }
 0x6b6   :  { %v1763_v27 = vpop.f32.mrb[13].mxu1  ;;  %v992_v28 = vsel %vm162_vm2, %v985_v26, -inf }
 0x6b7   :  { %993 = vmax.xlane.f32.xlu1 %v992_v28 }
 0x6c8   :  { %1011 = vrot.lane.b32.xlu1 %v2082_v12, %s1982_s13 }
 0x6cc   :  { %1176 = vrot.lane.b32.xlu1 %v2082_v12, %s1983_s14 }
 0x6d0   :  { %1254 = vrot.lane.b32.xlu1 %v2085_v13, %s1983_s14 }
 0x6d4   :  { %1252 = vrot.lane.b32.xlu1 %v2099_v17, %s1984_s15 }
 0x707   :  { %v991_v29 = vpop.xlane.xlu0 %990 }
 0x708   :  { %v995_v30 = vsub.f32 %v907_v21, %v991_v29 }
 0x70a   :  { %v997_v31 = vmul.f32 1.442695, %v995_v30 }
 0x70c   :  { %1858 = vpow2.f32 %v997_v31 }
 0x716   :  { %v1859_v32 = vpop.eup %1858 }
 0x717   :  { %v1001_v33 = vsel %vm162_vm2, %v1859_v32, 0.0 }
 0x718   :  { %1002 = vadd.xlane.f32.xlu0 %v1001_v33  ;;  %v1656_v33 = vld [vmem:[%s2236_s4] ss:$0 sm:$0xff] }
 0x72e   :  { %1087 = vrot.lane.b32.xlu0 %v2085_v13, %s1982_s13 }
 0x744   :  { %v994_v34 = vpop.xlane.xlu1 %993 }
 0x745   :  { %v996_v35 = vsub.f32 %v985_v26, %v994_v34 }
 0x747   :  { %v999_v36 = vmul.f32 1.442695, %v996_v35 }
 0x748   :  { %v1012_v37 = vpop.permute.xlu1 %1011 }
 0x749   :  { %1860 = vpow2.f32 %v999_v36  ;;  %1765 = vmatpush3.msra.mxu0 %v1012_v37 }
 0x74a   :  { %1774 = vmatprep.subr.mxu0 %v1973_v8 }
 0x74c   :  { %v1177_v43 = vpop.permute.xlu1 %1176 }
 0x750   :  { %v1255_v46 = vpop.permute.xlu1 %1254 }
 0x753   :  { %v1861_v38 = vpop.eup %1860 }
 0x754   :  { %v1004_v17 = vsel %vm162_vm2, %v1861_v38, 0.0  ;;  %v1253_v48 = vpop.permute.xlu1 %1252 }
 0x755   :  { %1005 = vadd.xlane.f32.xlu0 %v1004_v17 }
 0x76b   :  { %1174 = vrot.lane.b32.xlu0 %v2091_v15, %s1984_s15 }
 0x7a5   :  { %v1003_v39 = vpop.xlane.xlu0 %1002 }
 0x7a6   :  { %1862 = vrcp.f32 %v1003_v39 }
 0x7a9   :  { %v1088_v40 = vpop.permute.xlu0 %1087 }
 0x7aa   :  { %1770 = vmatpush3.msra.mxu1 %v1088_v40 }
 0x7ab   :  { %1779 = vmatprep.subr.mxu1 %v1973_v8 }
 0x7b0   :  { %v1863_v41 = vpop.eup %1862 }
 0x7b1   :  { %v1008_v42 = vmul.f32 %v1863_v41, %v1859_v32 }
 0x7b3   :  { %1767 = vmatmul.mubr.msk.f32.vlgmr.msra.gmra.mrb[8].mxu0 %vm162_vm2, %v1008_v42 }
 0x7b4   :  { %1775 = vmatpush3.xpose.msk.msra.mxu0 %vm162_vm2, %v1177_v43  ;;  %1776 = vmatprep.mubr.msk.f32.mxu0 %vm1974_vm1, %v1973_v8 }
 0x7b5   :  { %1784 = vmatprep.subr.mxu0 %v1973_v8 }
 0x7e2   :  { %v1006_v44 = vpop.xlane.xlu0 %1005 }
 0x7e3   :  { %1864 = vrcp.f32 %v1006_v44 }
 0x7e6   :  { %v1175_v15 = vpop.permute.xlu0 %1174 }
 0x7e7   :  { %1777 = vmatmul.mubr.msk.f32.vlgmr.msra.gmra.mrb[10].mxu0 %vm162_vm2, %v1175_v15 }
 0x7e8   :  { %1786 = vmatprep.mubr.msk.f32.mxu0 %vm1974_vm1, %v1973_v8 }
 0x7ed   :  { %v1865_v45 = vpop.eup %1864 }
 0x7ee   :  { %v1010_v47 = vmul.f32 %v1865_v45, %v1861_v38 }
 0x7f0   :  { %1772 = vmatmul.mubr.msk.f32.vlgmr.msra.gmra.mrb[14].mxu1 %vm162_vm2, %v1010_v47 }
 0x7f1   :  { %1780 = vmatpush3.xpose.msk.msra.mxu1 %vm162_vm2, %v1255_v46  ;;  %1781 = vmatprep.mubr.msk.f32.mxu1 %vm1974_vm1, %v1973_v8 }
 0x7f2   :  { %1789 = vmatprep.subr.mxu1 %v1973_v8 }
 0x7f4   :  { %1782 = vmatmul.mubr.msk.f32.vlgmr.msra.gmra.mrb[16].mxu1 %vm162_vm2, %v1253_v48 }
 0x7f5   :  { %1791 = vmatprep.mubr.msk.f32.mxu1 %vm1974_vm1, %v1973_v8 }
 0x886   :  { %v1083_v49 = vpop.f32.mrb[8].mxu0 }
 0x887   :  { %v1768_v50 = vpop.f32.mrb[9].mxu0 }
 0x8ba   :  { %v1248_v51 = vpop.f32.mrb[10].mxu0 }
 0x8bb   :  { %v1778_v52 = vpop.f32.mrb[11].mxu0  ;;  %v1330_v53 = vsel %vm162_vm2, %v1248_v51, -inf }
 0x8bc   :  { %1331 = vmax.xlane.f32.xlu0 %v1330_v53 }
 0x8c3   :  { %v1159_v54 = vpop.f32.mrb[14].mxu1 }
 0x8c4   :  { %v1773_v55 = vpop.f32.mrb[15].mxu1 }
 0x8c7   :  { %v1326_v56 = vpop.f32.mrb[16].mxu1 }
 0x8c8   :  { %v1783_v57 = vpop.f32.mrb[17].mxu1  ;;  %v1333_v58 = vsel %vm162_vm2, %v1326_v56, -inf }
 0x8c9   :  { %1334 = vmax.xlane.f32.xlu1 %v1333_v58 }
 0x8da   :  { %1352 = vrot.lane.b32.xlu1 %v2082_v12, %s1985_s16 }
 0x8de   :  { %824 = vrot.lane.b32.xlu1 %v2164_v19, %s1971_s6 }
 0x8e2   :  { %826 = vrot.lane.b32.xlu1 %v2167_v24, %s1971_s6  ;;  %v1519_v24 = vld [vmem:[#allocation8 + $0x10] sm:$0xff] }
 0x8e3   :  { %v1817_v26 = vpack.c.bf16 %v1520_v25, %v1519_v24 }
 0x8e6   :  { %1167 = vrot.lane.b32.xlu1 %v1159_v54, %s1986_s1 }
 0x949   :  { %v1332_v8 = vpop.xlane.xlu0 %1331 }
 0x94a   :  { %v1336_v59 = vsub.f32 %v1248_v51, %v1332_v8 }
 0x94c   :  { %v1338_v60 = vmul.f32 1.442695, %v1336_v59 }
 0x94e   :  { %1866 = vpow2.f32 %v1338_v60 }
 0x956   :  { %v1335_v61 = vpop.xlane.xlu1 %1334 }
 0x957   :  { %v1337_v62 = vsub.f32 %v1326_v56, %v1335_v61 }
 0x958   :  { %v1867_v63 = vpop.eup %1866 }
 0x959   :  { %v1340_v0 = vmul.f32 1.442695, %v1337_v62  ;;  %v1342_v1 = vsel %vm162_vm2, %v1867_v63, 0.0 }
 0x95a   :  { %1343 = vadd.xlane.f32.xlu0 %v1342_v1  ;;  %v1353_v12 = vpop.permute.xlu1 %1352 }
 0x95b   :  { %1868 = vpow2.f32 %v1340_v0  ;;  %1785 = vmatpush3.msra.mxu0 %v1353_v12 }
 0x95e   :  { %v825_v2 = vpop.permute.xlu1 %824 }
 0x95f   :  { %831 = vst.msk [vmem:[#allocation2] sm:$0xff] %vm830_vm3, %v825_v2 }
 0x962   :  { %v827_v3 = vpop.permute.xlu1 %826 }
 0x963   :  { %832 = vst.msk [vmem:[#allocation2 + $0x8] sm:$0xff] %vm830_vm3, %v827_v3 }
 0x965   :  { %v1869_v4 = vpop.eup %1868 }
 0x966   :  { %v1168_v5 = vpop.permute.xlu1 %1167  ;;  %v1345_v6 = vsel %vm162_vm2, %v1869_v4, 0.0 }
 0x967   :  { %1173 = vst.msk [vmem:[#allocation2 + $0x8] sm:$0xff] %vm1171_vm4, %v1168_v5  ;;  %1346 = vadd.xlane.f32.xlu0 %v1345_v6 }
 0x97d   :  { %1428 = vrot.lane.b32.xlu0 %v2085_v13, %s1985_s16  ;;  %v1518_v13 = vld [vmem:[#allocation8 + $0x8] sm:$0xff] }
 0x97e   :  { %v1813_v22 = vpack.c.bf16 %v1518_v13, %v1517_v20 }
 0x980   :  { %1814 = vmatprep.subr.bf16.mxu0 %v1813_v22 }
 0x981   :  { %1165 = vrot.lane.b32.xlu0 %v1083_v49, %s1986_s1 }
 0x9e7   :  { %v1344_v7 = vpop.xlane.xlu0 %1343 }
 0x9e8   :  { %1870 = vrcp.f32 %v1344_v7 }
 0x9f2   :  { %v1871_v9 = vpop.eup %1870 }
 0x9f3   :  { %v1349_v10 = vmul.f32 %v1871_v9, %v1867_v63 }
 0x9f4   :  { %v1347_v11 = vpop.xlane.xlu0 %1346 }
 0x9f5   :  { %1872 = vrcp.f32 %v1347_v11  ;;  %1787 = vmatmul.mubr.msk.f32.vlgmr.msra.gmra.mrb[12].mxu0 %vm162_vm2, %v1349_v10 }
 0x9f6   :  { %1816 = vmatpush3.bf16.msra.mxu0 %v1813_v22 }
 0x9f7   :  { %1818 = vmatprep.subr.bf16.mxu0 %v1817_v26 }
 0x9f8   :  { %v1429_v14 = vpop.permute.xlu0 %1428 }
 0x9f9   :  { %1790 = vmatpush3.msra.mxu1 %v1429_v14 }
 0x9fa   :  { %1820 = vmatpush3.bf16.msra.mxu0 %v1817_v26 }
 0x9fc   :  { %v1166_v16 = vpop.permute.xlu0 %1165 }
 0x9fd   :  { %1172 = vst.msk [vmem:[#allocation2] sm:$0xff] %vm1171_vm4, %v1166_v16 }
 0x9ff   :  { %v1873_v18 = vpop.eup %1872 }
 0xa00   :  { %v1351_v19 = vmul.f32 %v1873_v18, %v1869_v4 }
 0xa02   :  { %1792 = vmatmul.mubr.msk.f32.vlgmr.msra.gmra.mrb[18].mxu1 %vm162_vm2, %v1351_v19 }
 0xac8   :  { %v1424_v21 = vpop.f32.mrb[12].mxu0 }
 0xac9   :  { %1506 = vrot.lane.b32.xlu0 %v1424_v21, %s1987_s17  ;;  %v1788_v23 = vpop.f32.mrb[13].mxu0 }
 0xad5   :  { %v1500_v27 = vpop.f32.mrb[18].mxu1 }
 0xad6   :  { %1508 = vrot.lane.b32.xlu1 %v1500_v27, %s1987_s17  ;;  %v1793_v28 = vpop.f32.mrb[19].mxu1 }
 0xb3b   :  { %v1507_v29 = vpop.permute.xlu0 %1506 }
 0xb3c   :  { %1513 = vst.msk [vmem:[#allocation2] sm:$0xff] %vm1512_vm5, %v1507_v29 }
 0xb43   :  { %v1515_v30 = vld [vmem:[#allocation2] sm:$0xff] }
 0xb44   :  { %1802 = vmatprep.mubr.msk.f32.mxu0 %vm75_vm0, %v1515_v30 }
 0xb48   :  { %v1509_v31 = vpop.permute.xlu1 %1508 }
 0xb49   :  { %1514 = vst.msk [vmem:[#allocation2 + $0x8] sm:$0xff] %vm1512_vm5, %v1509_v31 }
 0xb50   :  { %v1516_v32 = vld [vmem:[#allocation2 + $0x8] sm:$0xff] }
 0xb51   :  { %1803 = vmatmul.mubr.msk.f32.vlgmr.msra.gmra.mrb[14].mxu0 %vm75_vm0, %v1516_v32 }
 0xc24   :  { %v1804_v34 = vpop.f32.mrb[14].mxu0 }
 0xc25   :  { %v1606_v35 = vadd.f32 %v1804_v34, %v1656_v33  ;;  %v1600_v36 = vpop.f32.mrb[15].mxu0 }
 0xc26   :  { %v1601_v37 = vadd.f32 %v1656_v33, %v1600_v36 }
 0xc27   :  { %1610 = vst.msk [vmem:[#allocation9 + $0x8] sm:$0xff] %vm75_vm0, %v1606_v35 }
 0xc28   :  { %1609 = vst.msk [vmem:[#allocation9] sm:$0xff] %vm75_vm0, %v1601_v37 }
 0xc29   :  { %1951 = shalt.err (!%p1948_p0)
}
 0xc2a   :  { %s1952_s25 = scalar_lea.hbm %s2237_s5, 256 }
 0xc2b   :  { %p1953_p1 = scmp.ne.s32.totalorder %s2237_s5, %s1952_s25  ;;  %p1956_p2 = scmp.lt.u32.totalorder %s1952_s25, %s2237_s5 }
 0xc2d   :  { %p1958_p3 = pnand %p1956_p2, %p1953_p1 }
 0xc2f   :  { %1961 = shalt.err (!%p1958_p3)
}
 0xc30   :  { %1622 = dma.vmem_to_hbm [thread:$0]  %s1617_s22, 256, %s2237_s5, [#allocation5], %s1970_s30, %s1970_s30, %s1971_s6  }
 0xc31   :  { %1966 = dma.done.wait [#allocation5], 256  }
 0xc32   :  { %1967 = vsyncadd [#allocation5], 4294967040 }
 0xc33   :  { %1626 = vsyncpa [#allocation4], 1 }
 0xc34   :  { %1627 = vsyncpa [#allocation7], 1 }
 0xc35   :  { %1628 = vsyncpa [#allocation5], 1 }

</bundles_post_ra>
